<compile_context>
chip_gen: v7x
topology: tpu7x:2x2x1
jax: 0.10.0
libtpu: 0.0.40
codegen_flags: <defaults>
</compile_context>

<pallas_src>
import jax
import jax.numpy as jnp
from jax.experimental import pallas as pl
from jax.experimental.pallas import tpu as pltpu

BN_EPS = 1e-5
LANE = 128
SUBLANE = 8


def _round_up(n, m):
    return ((n + m - 1) // m) * m


def _cdiv(a, b):
    return -(-a // b)


def _num_tensorcores():
    """TensorCores per chip: 2 on v4 / v5p / v7x (megacore), else 1."""
    try:
        kind = jax.devices()[0].device_kind.lower()
    except Exception:
        return 1
    if "v7" in kind or "7x" in kind or "v5p" in kind or "v4" in kind:
        return 2
    return 1


def _resident_spec(shape):
    """Full-array block with constant index_map, single pipeline buffer."""
    try:
        return pl.BlockSpec(shape, lambda i: (0, 0), pipeline_mode=pl.Buffered(1))
    except TypeError:  # older BlockSpec without pipeline_mode kwarg
        return pl.BlockSpec(shape, lambda i: (0, 0))


# ----------------------------------------------------------------------------
# Kernel
# ----------------------------------------------------------------------------
def _make_kernel(n_layers):
    def kernel(*refs):
        x_ref = refs[0]
        out_ref = refs[-1]
        wb = refs[1:-1]                       # (w1, b1, w2, b2, ..., wL, bL)

        h = x_ref[...]                        # bf16 input tile
        for li in range(n_layers):
            w_ref, b_ref = wb[2 * li], wb[2 * li + 1]
            # bf16 operands -> MXU, f32 accumulation; bias + ReLU in f32.
            lhs = h if h.dtype == jnp.bfloat16 else h.astype(jnp.bfloat16)
            y = jnp.dot(lhs, w_ref[...],
                        preferred_element_type=jnp.float32) + b_ref[...]
            h = jnp.maximum(y, 0.0) if li < n_layers - 1 else y
        out_ref[...] = h.astype(out_ref.dtype)   # bf16 lane-dense store

    return kernel


# ----------------------------------------------------------------------------
# Offline parameter preparation (BN fold, lane padding, bf16 cast)
# ----------------------------------------------------------------------------
def fold_bn_params(params):
    """Fold eval-mode BatchNorm1d of block i into Linear i+1 (all in f32)."""
    n_blocks = (len(params) - 2) // 6
    ws, bs = [], []
    s_prev = t_prev = None
    for i in range(n_blocks):
        w, b, g, be, rm, rv = [jnp.asarray(p, jnp.float32)
                               for p in params[6 * i: 6 * i + 6]]
        if s_prev is not None:                # fold previous block's BN into W
            b = b + t_prev @ w
            w = s_prev[:, None] * w
        ws.append(w)
        bs.append(b)
        inv_std = 1.0 / jnp.sqrt(rv + BN_EPS)
        s_prev = g * inv_std                  # per-feature scale after ReLU
        t_prev = be - rm * s_prev             # per-feature shift after ReLU
    w = jnp.asarray(params[-2], jnp.float32)
    b = jnp.asarray(params[-1], jnp.float32)
    b = b + t_prev @ w
    w = s_prev[:, None] * w
    ws.append(w)
    bs.append(b)
    return ws, bs


def prepare_params(params):
    """Offline: fold BN, lane-pad hidden and output features, cast W->bf16."""
    ws, bs = fold_bn_params(params)
    n_layers = len(ws)

    # Lane-pad every hidden feature dim (ReLU(0)=0; zero next-layer rows are inert).
    for i in range(n_layers - 1):
        h = ws[i].shape[1]
        h_pad = _round_up(h, LANE)
        if h_pad != h:
            ws[i] = jnp.pad(ws[i], ((0, 0), (0, h_pad - h)))
            bs[i] = jnp.pad(bs[i], (0, h_pad - h))
            ws[i + 1] = jnp.pad(ws[i + 1], ((0, h_pad - h), (0, 0)))

    # Lane-pad the final output features (unmasked lane-dense stores).
    out_dim = ws[-1].shape[1]
    out_pad = _round_up(out_dim, LANE)
    if out_pad != out_dim:
        ws[-1] = jnp.pad(ws[-1], ((0, 0), (0, out_pad - out_dim)))
        bs[-1] = jnp.pad(bs[-1], (0, out_pad - out_dim))

    ws = [w.astype(jnp.bfloat16) for w in ws]
    bs = [b.reshape(1, -1).astype(jnp.float32) for b in bs]
    return ws, bs, out_dim


# ----------------------------------------------------------------------------
# Forward pass
# ----------------------------------------------------------------------------
def custom_network_forward(x, prepared, tile_b_max=1024):
    """x: [B, input_dim].  prepared: output of prepare_params()."""
    ws, bs, out_dim = prepared
    x = jnp.asarray(x, jnp.bfloat16)          # halve input HBM read / DMA
    B, in_dim = x.shape
    n_layers = len(ws)
    out_pad = ws[-1].shape[1]

    # Generation-aware batch grid:
    #   1-TC chips (v5e/v6e): as few steps as possible (single step for small B).
    #   2-TC chips (v7x/v5p/v4): step count kept a multiple of 2 so both cores work.
    num_tc = _num_tensorcores()
    steps = max(num_tc, _cdiv(B, tile_b_max))
    steps = _round_up(steps, num_tc)
    tile_b = _round_up(_cdiv(B, steps), SUBLANE)
    b_pad = steps * tile_b
    if b_pad != B:
        x = jnp.pad(x, ((0, b_pad - B), (0, 0)))
    grid = (steps,)

    # Resident (single-buffered) full-array weight/bias blocks.
    wb_inputs, wb_specs = [], []
    for w, b in zip(ws, bs):
        wb_inputs += [w, b]
        wb_specs += [_resident_spec(w.shape), _resident_spec(b.shape)]

    dims = [in_dim] + [w.shape[1] for w in ws]
    flops = 2 * b_pad * sum(dims[i] * dims[i + 1] for i in range(n_layers))
    w_bytes = sum(w.size * 2 for w in ws)
    b_bytes = sum(b.size * 4 for b in bs)
    bytes_accessed = x.size * 2 + w_bytes + b_bytes + b_pad * out_pad * 2

    # Explicit VMEM budget (double-buffered x/out tiles, resident weights,
    # f32 activation temporaries) -- capped at v7x's 64 MiB physical VMEM.
    max_feat = max(dims)
    vmem_est = (2 * tile_b * in_dim * 2
                + 2 * tile_b * out_pad * 2
                + w_bytes + b_bytes
                + 3 * tile_b * max_feat * 4)
    vmem_limit = int(min(64 * 2**20, max(16 * 2**20, 2 * vmem_est)))

    out = pl.pallas_call(
        _make_kernel(n_layers),
        out_shape=jax.ShapeDtypeStruct((b_pad, out_pad), jnp.bfloat16),
        grid_spec=pltpu.PrefetchScalarGridSpec(
            num_scalar_prefetch=0,
            grid=grid,
            in_specs=[pl.BlockSpec((tile_b, in_dim), lambda i: (i, 0))] + wb_specs,
            out_specs=pl.BlockSpec((tile_b, out_pad), lambda i: (i, 0)),
        ),
        compiler_params=pltpu.CompilerParams(
            dimension_semantics=("parallel",),
            vmem_limit_bytes=vmem_limit),
        cost_estimate=pl.CostEstimate(flops=flops, transcendentals=0,
                                      bytes_accessed=bytes_accessed),
    )(x, *wb_inputs)

    return out[:B, :out_dim].astype(jnp.float32)


# ----------------------------------------------------------------------------
# Deterministic init + pure-JAX f32 reference (eval-mode semantics)
# ----------------------------------------------------------------------------
def init_params(key, input_dim, output_dim, hidden_sizes):
    """Each hidden block: W [in,out], b, gamma, beta, running_mean, running_var."""
    params = []
    prev = input_dim
    for h in hidden_sizes:
        key, kw, kb, kg, kbe, krm, krv = jax.random.split(key, 7)
        scale = prev ** -0.5
        params += [
            jax.random.normal(kw, (prev, h), jnp.float32) * scale,
            jax.random.normal(kb, (h,), jnp.float32) * 0.01,
            1.0 + 0.1 * jax.random.normal(kg, (h,), jnp.float32),             # gamma
            0.05 * jax.random.normal(kbe, (h,), jnp.float32),                 # beta
            0.05 * jax.random.normal(krm, (h,), jnp.float32),                 # running_mean
            1.0 + 0.1 * jnp.abs(jax.random.normal(krv, (h,), jnp.float32)),   # running_var
        ]
        prev = h
    key, kw, kb = jax.random.split(key, 3)
    params += [
        jax.random.normal(kw, (prev, output_dim), jnp.float32) * (prev ** -0.5),
        jax.random.normal(kb, (output_dim,), jnp.float32) * 0.01,
    ]
    return params


def reference_forward(x, params):
    """Pure-JAX f32 reference (Linear -> ReLU -> BN(eval) -> Dropout(id))."""
    n_blocks = (len(params) - 2) // 6
    h = x
    for i in range(n_blocks):
        w, b, g, be, rm, rv = params[6 * i: 6 * i + 6]
        h = jnp.maximum(h @ w + b, 0.0)
        h = (h - rm) / jnp.sqrt(rv + BN_EPS) * g + be
    w, b = params[-2], params[-1]
    return h @ w + b


if __name__ == "__main__":
    B = 256
    INPUT_DIM = 32
    OUTPUT_DIM = 8
    HIDDEN = [256, 128, 64]

    key = jax.random.PRNGKey(0)
    kx, kp = jax.random.split(key)
    x = jax.random.normal(kx, (B, INPUT_DIM), jnp.float32)
    params = init_params(kp, INPUT_DIM, OUTPUT_DIM, HIDDEN)

    prepared = prepare_params(params)            # offline BN fold / pad / bf16
    out = custom_network_forward(x, prepared)
    out = jax.block_until_ready(out)

    ref = reference_forward(x, params)
    assert out.shape == (B, OUTPUT_DIM), out.shape
    # bf16 matmul operands / bf16 output store with f32 accumulation ->
    # relaxed tolerance vs the pure-f32 reference.
    max_err = float(jnp.max(jnp.abs(out - ref)))
    assert jnp.allclose(out, ref, atol=4e-2, rtol=4e-2), \
        f"mismatch vs reference (max_err={max_err})"

    print("KERNEL_OK")
</pallas_src>

<mosaic_0001>
module attributes {stable_mosaic.version = 11 : i64} {
  func.func @kernel(%arg0: i32, %arg1: memref<256x32xbf16, #tpu.memory_space<vmem>>, %arg2: memref<32x256xbf16, #tpu.memory_space<vmem>>, %arg3: memref<1x256xf32, #tpu.memory_space<vmem>>, %arg4: memref<256x128xbf16, #tpu.memory_space<vmem>>, %arg5: memref<1x128xf32, #tpu.memory_space<vmem>>, %arg6: memref<128x128xbf16, #tpu.memory_space<vmem>>, %arg7: memref<1x128xf32, #tpu.memory_space<vmem>>, %arg8: memref<128x128xbf16, #tpu.memory_space<vmem>>, %arg9: memref<1x128xf32, #tpu.memory_space<vmem>>, %arg10: memref<256x128xbf16, #tpu.memory_space<vmem>>) attributes {dimension_semantics = [#tpu.dimension_semantics<parallel>], iteration_bounds = array<i64: 1>, scalar_prefetch = 0 : i64, scratch_operands = 0 : i64, tpu.core_type = #tpu.core_type<tc>, window_params = [{transform_indices = @transform_0, window_bounds = array<i64: 256, 32>}, {pipeline_mode = #tpu.pipeline_mode<synchronous>, transform_indices = @transform_1, window_bounds = array<i64: 32, 256>}, {pipeline_mode = #tpu.pipeline_mode<synchronous>, transform_indices = @transform_2, window_bounds = array<i64: 1, 256>}, {pipeline_mode = #tpu.pipeline_mode<synchronous>, transform_indices = @transform_3, window_bounds = array<i64: 256, 128>}, {pipeline_mode = #tpu.pipeline_mode<synchronous>, transform_indices = @transform_4, window_bounds = array<i64: 1, 128>}, {pipeline_mode = #tpu.pipeline_mode<synchronous>, transform_indices = @transform_5, window_bounds = array<i64: 128, 128>}, {pipeline_mode = #tpu.pipeline_mode<synchronous>, transform_indices = @transform_6, window_bounds = array<i64: 1, 128>}, {pipeline_mode = #tpu.pipeline_mode<synchronous>, transform_indices = @transform_7, window_bounds = array<i64: 128, 128>}, {pipeline_mode = #tpu.pipeline_mode<synchronous>, transform_indices = @transform_8, window_bounds = array<i64: 1, 128>}, {transform_indices = @transform_9, window_bounds = array<i64: 256, 128>}]} {
    %c0 = arith.constant 0 : index
    %c0_0 = arith.constant 0 : index
    %0 = vector.load %arg1[%c0, %c0_0] : memref<256x32xbf16, #tpu.memory_space<vmem>>, vector<256x32xbf16>
    %c0_1 = arith.constant 0 : index
    %c0_2 = arith.constant 0 : index
    %1 = vector.load %arg2[%c0_1, %c0_2] : memref<32x256xbf16, #tpu.memory_space<vmem>>, vector<32x256xbf16>
    %cst = arith.constant dense<0.000000e+00> : vector<256x256xf32>
    %2 = tpu.matmul %0, %1, %cst {dimension_numbers = #tpu.dot_dimension_numbers<[1], [0], [0], [1], [0, 0, 1, 1], [], []>} : vector<256x32xbf16>, vector<32x256xbf16>, vector<256x256xf32> -> vector<256x256xf32>
    %c0_3 = arith.constant 0 : index
    %c0_4 = arith.constant 0 : index
    %3 = vector.load %arg3[%c0_3, %c0_4] : memref<1x256xf32, #tpu.memory_space<vmem>>, vector<1x256xf32>
    %4 = vector.broadcast %3 : vector<1x256xf32> to vector<256x256xf32>
    %5 = arith.addf %2, %4 : vector<256x256xf32>
    %cst_5 = arith.constant 0.000000e+00 : f32
    %6 = vector.broadcast %cst_5 : f32 to vector<256x256xf32>
    %7 = arith.maximumf %5, %6 : vector<256x256xf32>
    %8 = arith.truncf %7 : vector<256x256xf32> to vector<256x256xbf16>
    %c0_6 = arith.constant 0 : index
    %c0_7 = arith.constant 0 : index
    %9 = vector.load %arg4[%c0_6, %c0_7] : memref<256x128xbf16, #tpu.memory_space<vmem>>, vector<256x128xbf16>
    %cst_8 = arith.constant dense<0.000000e+00> : vector<256x128xf32>
    %10 = tpu.matmul %8, %9, %cst_8 {dimension_numbers = #tpu.dot_dimension_numbers<[1], [0], [0], [1], [0, 0, 1, 1], [], []>} : vector<256x256xbf16>, vector<256x128xbf16>, vector<256x128xf32> -> vector<256x128xf32>
    %c0_9 = arith.constant 0 : index
    %c0_10 = arith.constant 0 : index
    %11 = vector.load %arg5[%c0_9, %c0_10] : memref<1x128xf32, #tpu.memory_space<vmem>>, vector<1x128xf32>
    %12 = vector.broadcast %11 : vector<1x128xf32> to vector<256x128xf32>
    %13 = arith.addf %10, %12 : vector<256x128xf32>
    %cst_11 = arith.constant 0.000000e+00 : f32
    %14 = vector.broadcast %cst_11 : f32 to vector<256x128xf32>
    %15 = arith.maximumf %13, %14 : vector<256x128xf32>
    %16 = arith.truncf %15 : vector<256x128xf32> to vector<256x128xbf16>
    %c0_12 = arith.constant 0 : index
    %c0_13 = arith.constant 0 : index
    %17 = vector.load %arg6[%c0_12, %c0_13] : memref<128x128xbf16, #tpu.memory_space<vmem>>, vector<128x128xbf16>
    %cst_14 = arith.constant dense<0.000000e+00> : vector<256x128xf32>
    %18 = tpu.matmul %16, %17, %cst_14 {dimension_numbers = #tpu.dot_dimension_numbers<[1], [0], [0], [1], [0, 0, 1, 1], [], []>} : vector<256x128xbf16>, vector<128x128xbf16>, vector<256x128xf32> -> vector<256x128xf32>
    %c0_15 = arith.constant 0 : index
    %c0_16 = arith.constant 0 : index
    %19 = vector.load %arg7[%c0_15, %c0_16] : memref<1x128xf32, #tpu.memory_space<vmem>>, vector<1x128xf32>
    %20 = vector.broadcast %19 : vector<1x128xf32> to vector<256x128xf32>
    %21 = arith.addf %18, %20 : vector<256x128xf32>
    %cst_17 = arith.constant 0.000000e+00 : f32
    %22 = vector.broadcast %cst_17 : f32 to vector<256x128xf32>
    %23 = arith.maximumf %21, %22 : vector<256x128xf32>
    %24 = arith.truncf %23 : vector<256x128xf32> to vector<256x128xbf16>
    %c0_18 = arith.constant 0 : index
    %c0_19 = arith.constant 0 : index
    %25 = vector.load %arg8[%c0_18, %c0_19] : memref<128x128xbf16, #tpu.memory_space<vmem>>, vector<128x128xbf16>
    %cst_20 = arith.constant dense<0.000000e+00> : vector<256x128xf32>
    %26 = tpu.matmul %24, %25, %cst_20 {dimension_numbers = #tpu.dot_dimension_numbers<[1], [0], [0], [1], [0, 0, 1, 1], [], []>} : vector<256x128xbf16>, vector<128x128xbf16>, vector<256x128xf32> -> vector<256x128xf32>
    %c0_21 = arith.constant 0 : index
    %c0_22 = arith.constant 0 : index
    %27 = vector.load %arg9[%c0_21, %c0_22] : memref<1x128xf32, #tpu.memory_space<vmem>>, vector<1x128xf32>
    %28 = vector.broadcast %27 : vector<1x128xf32> to vector<256x128xf32>
    %29 = arith.addf %26, %28 : vector<256x128xf32>
    %30 = arith.truncf %29 : vector<256x128xf32> to vector<256x128xbf16>
    %c0_23 = arith.constant 0 : index
    %c0_24 = arith.constant 0 : index
    %31 = vector.load %arg10[%c0_23, %c0_24] : memref<256x128xbf16, #tpu.memory_space<vmem>>, vector<256x128xbf16>
    tpu.vector_store %arg10[%c0_23, %c0_24], %30 {strides = array<i32>} : memref<256x128xbf16, #tpu.memory_space<vmem>>, vector<256x128xbf16>,
    return
  }
  func.func @transform_0(%arg0: i32) -> (i32, i32) {
    %c0_i32 = arith.constant 0 : i32
    %c0_i32_0 = arith.constant 0 : i32
    return %arg0, %c0_i32 : i32, i32
  }
  func.func @transform_1(%arg0: i32) -> (i32, i32) {
    %c0_i32 = arith.constant 0 : i32
    %c0_i32_0 = arith.constant 0 : i32
    %c0_i32_1 = arith.constant 0 : i32
    return %c0_i32, %c0_i32_0 : i32, i32
  }
  func.func @transform_2(%arg0: i32) -> (i32, i32) {
    %c0_i32 = arith.constant 0 : i32
    %c0_i32_0 = arith.constant 0 : i32
    %c0_i32_1 = arith.constant 0 : i32
    return %c0_i32, %c0_i32_0 : i32, i32
  }
  func.func @transform_3(%arg0: i32) -> (i32, i32) {
    %c0_i32 = arith.constant 0 : i32
    %c0_i32_0 = arith.constant 0 : i32
    %c0_i32_1 = arith.constant 0 : i32
    return %c0_i32, %c0_i32_0 : i32, i32
  }
  func.func @transform_4(%arg0: i32) -> (i32, i32) {
    %c0_i32 = arith.constant 0 : i32
    %c0_i32_0 = arith.constant 0 : i32
    %c0_i32_1 = arith.constant 0 : i32
    return %c0_i32, %c0_i32_0 : i32, i32
  }
  func.func @transform_5(%arg0: i32) -> (i32, i32) {
    %c0_i32 = arith.constant 0 : i32
    %c0_i32_0 = arith.constant 0 : i32
    %c0_i32_1 = arith.constant 0 : i32
    return %c0_i32, %c0_i32_0 : i32, i32
  }
  func.func @transform_6(%arg0: i32) -> (i32, i32) {
    %c0_i32 = arith.constant 0 : i32
    %c0_i32_0 = arith.constant 0 : i32
    %c0_i32_1 = arith.constant 0 : i32
    return %c0_i32, %c0_i32_0 : i32, i32
  }
  func.func @transform_7(%arg0: i32) -> (i32, i32) {
    %c0_i32 = arith.constant 0 : i32
    %c0_i32_0 = arith.constant 0 : i32
    %c0_i32_1 = arith.constant 0 : i32
    return %c0_i32, %c0_i32_0 : i32, i32
  }
  func.func @transform_8(%arg0: i32) -> (i32, i32) {
    %c0_i32 = arith.constant 0 : i32
    %c0_i32_0 = arith.constant 0 : i32
    %c0_i32_1 = arith.constant 0 : i32
    return %c0_i32, %c0_i32_0 : i32, i32
  }
  func.func @transform_9(%arg0: i32) -> (i32, i32) {
    %c0_i32 = arith.constant 0 : i32
    %c0_i32_0 = arith.constant 0 : i32
    return %arg0, %c0_i32 : i32, i32
  }
}

</mosaic_0001>

<bundles_post_ra>
// kernel: tpu_custom_call.1
= control target key start
LH: loop header
LB: loop body
LE: loop exit
PB: predicated region body
PF: predicated region fallthrough
CT: control target
= control target key end

     0   :  { %14 = vsyncpa [#allocation3], 0  ;;  %s2639_s0 = inlined_call_operand.vmem [shape: bf16[256,32], index: 0, kind: input, shape index: {}]   ;;  %s2640_s1 = inlined_call_operand.vmem [shape: bf16[32,256], index: 1, kind: input, shape index: {}]   ;;  %s2641_s2 = inlined_call_operand.vmem [shape: f32[1,256], index: 2, kind: input, shape index: {}]   ;;  %s2642_s3 = inlined_call_operand.vmem [shape: bf16[256,128], index: 3, kind: input, shape index: {}]   ;;  %s2643_s4 = inlined_call_operand.vmem [shape: f32[1,128], index: 4, kind: input, shape index: {}]   ;;  %s2644_s5 = inlined_call_operand.hbm [shape: bf16[128,128], index: 5, kind: input, shape index: {}]   ;;  %s2645_s6 = inlined_call_operand.vmem [shape: f32[1,128], index: 6, kind: input, shape index: {}]   ;;  %s2646_s7 = inlined_call_operand.hbm [shape: bf16[128,128], index: 7, kind: input, shape index: {}]   ;;  %s2647_s8 = inlined_call_operand.vmem [shape: f32[1,128], index: 8, kind: input, shape index: {}]   ;;  %s2648_s9 = inlined_call_operand.hbm [shape: bf16[256,128], index: 9, kind: output, shape index: {}]  }
   0x1   :  { %15 = vsyncpa [#allocation6], 0 }
   0x2   :  { %16 = vsyncpa [#allocation4], 0  ;;  %s2216_s30 = smov [#allocation2]   ;;  %s2144_s13 = scalar_lea.hbm %s2644_s5, 1024 }
   0x3   :  { %s32_s10 = sshll.u32 %s2216_s30, 4  ;;  %p2145_p0 = scmp.ne.s32.totalorder %s2644_s5, %s2144_s13  ;;  %s33_s10 = int_to_ptr.vmem [resolvable:$true] %s32_s10 }
   0x4   :  { %p2148_p1 = scmp.lt.u32.totalorder %s2144_s13, %s2644_s5 }
   0x6   :  { %p2150_p2 = pnand %p2148_p1, %p2145_p0 }
   0x8   :  { %2153 = shalt.err (!%p2150_p2)
}
   0x9   :  { %s2154_s18 = scalar_lea.vmem %s33_s10, 1024  ;;  %p2159_p4 = scmp.lt.s32.totalorder %s33_s10, %s33_s10 }
   0xa   :  { %p2155_p3 = scmp.ne.s32.totalorder %s33_s10, %s2154_s18  ;;  %p2160_p5 = scmp.lt.s32.totalorder %s2154_s18, %s2154_s18 }
   0xc   :  { %p2161_p6 = por %p2160_p5, %p2159_p4 }
   0xe   :  { %p2162_p7 = pnand %p2161_p6, %p2155_p3 }
  0x10   :  { %2165 = shalt.err (!%p2162_p7)
}
  0x11   :  { %s2217_s19 = smov 64   ;;  %s2218_s20 = smov 4  }
  0x12   :  { %38 = dma.hbm_to_vmem [thread:$0]  %s2644_s5, 1024, %s33_s10, [#allocation3], %s2217_s19, %s2217_s19, %s2218_s20  }
  0x13   :  { %s2219_s23 = smov [#allocation5]   ;;  %s2166_s27 = scalar_lea.hbm %s2646_s7, 1024 }
  0x14   :  { %s46_s24 = sshll.u32 %s2219_s23, 4  ;;  %p2167_p8 = scmp.ne.s32.totalorder %s2646_s7, %s2166_s27  ;;  %s47_s24 = int_to_ptr.vmem [resolvable:$true] %s46_s24 }
  0x15   :  { %p2170_p9 = scmp.lt.u32.totalorder %s2166_s27, %s2646_s7 }
  0x17   :  { %p2172_p10 = pnand %p2170_p9, %p2167_p8 }
  0x19   :  { %2175 = shalt.err (!%p2172_p10)
}
  0x1a   :  { %s2176_s12 = scalar_lea.vmem %s47_s24, 1024  ;;  %p2181_p12 = scmp.lt.s32.totalorder %s47_s24, %s47_s24 }
  0x1b   :  { %p2177_p11 = scmp.ne.s32.totalorder %s47_s24, %s2176_s12  ;;  %p2182_p13 = scmp.lt.s32.totalorder %s2176_s12, %s2176_s12 }
  0x1d   :  { %p2183_p0 = por %p2182_p13, %p2181_p12 }
  0x1f   :  { %p2184_p1 = pnand %p2183_p0, %p2177_p11 }
  0x21   :  { %2187 = shalt.err (!%p2184_p1)
}
  0x22   :  { %52 = dma.hbm_to_vmem [thread:$0]  %s2646_s7, 1024, %s47_s24, [#allocation6], %s2217_s19, %s2217_s19, %s2218_s20  }
  0x23   :  { %2210 = dma.done.wait [#allocation3], 1024  }
  0x24   :  { %2211 = vsyncadd [#allocation3], 4294966272 }
  0x25   :  { %2212 = dma.done.wait [#allocation6], 1024  }
  0x26   :  { %2213 = vsyncadd [#allocation6], 4294966272  ;;  %v2220_v0 = vmov 0   ;;  %v2090_v1 = vld [vmem:[%s2640_s1 + $0x4] ss:$8 sps:$4 sm:$0xff]   ;;  %vm210_vm0 = vcmask 261120   ;;  %v100_v37 = vlaneseq }
  0x27   :  { %291 = vmatprep.mubr.bf16.mxu0 %v2220_v0  ;;  %v2092_v2 = vld [vmem:[%s2640_s1] ss:$8 sps:$4 sm:$0xff]   ;;  %259 = vmatprep.subr.bf16.mxu0 %v2090_v1  ;;  %v2093_v3 = vld [vmem:[%s2640_s1 + $0x14] ss:$8 sps:$4 sm:$0xff]   ;;  %v2095_v4 = vld [vmem:[%s2640_s1 + $0x10] ss:$8 sps:$4 sm:$0xff]  }
  0x28   :  { %260 = vmatpush1.bf16.msra.mxu0 %v2092_v2  ;;  %v2096_v5 = vld [vmem:[%s2639_s0] sm:$0xff]   ;;  %v2097_v6 = vld [vmem:[%s2639_s0 + $0x8] sm:$0xff]   ;;  %v2098_v8 = vld [vmem:[%s2639_s0 + $0x10] sm:$0xff]   ;;  %v101_v38 = vshrl.u32 %v100_v37, 7 }
  0x29   :  { %261 = vmatprep.subr.bf16.mxu0 %v2093_v3  ;;  %v2112_v7 = vld [vmem:[%s2642_s3 + $0x40] sm:$0xff]   ;;  %v2114_v10 = vld [vmem:[%s2642_s3 + $0x48] sm:$0xff]   ;;  %v2116_v12 = vld [vmem:[%s2642_s3 + $0x50] sm:$0xff]  }
  0x2a   :  { %v2113_v9 = vld [vmem:[%s2642_s3] sm:$0xff]   ;;  %1812 = vmatprep.subr.bf16.mxu1 %v2112_v7  ;;  %v2115_v11 = vld [vmem:[%s2642_s3 + $0x8] sm:$0xff]   ;;  %v2117_v13 = vld [vmem:[%s2642_s3 + $0x10] sm:$0xff]   ;;  %v102_v39 = vsub.s32 0, %v101_v38  ;;  %v106_v41 = vsub.s32 1, %v101_v38 }
  0x2b   :  { %1813 = vmatpush3.bf16.msra.mxu1 %v2113_v9  ;;  %v2118_v14 = vld [vmem:[%s2642_s3 + $0x58] sm:$0xff]   ;;  %v2120_v17 = vld [vmem:[%s2642_s3 + $0x60] sm:$0xff]   ;;  %v2122_v19 = vld [vmem:[%s2642_s3 + $0x68] sm:$0xff]  }
  0x2c   :  { %262 = vmatpush1.bf16.msra.mxu0 %v2095_v4  ;;  %1814 = vmatprep.subr.bf16.mxu1 %v2114_v10  ;;  %v2099_v15 = vld [vmem:[%s2639_s0 + $0x18] sm:$0xff]   ;;  %v2121_v18 = vld [vmem:[%s2642_s3 + $0x20] sm:$0xff]   ;;  %v2101_v21 = vld [vmem:[%s2639_s0 + $0x28] sm:$0xff]  }
  0x2d   :  { %v2119_v16 = vld [vmem:[%s2642_s3 + $0x18] sm:$0xff]   ;;  %v2100_v20 = vld [vmem:[%s2639_s0 + $0x20] sm:$0xff]   ;;  %v2102_v22 = vld [vmem:[%s2639_s0 + $0x30] sm:$0xff]  }
  0x2e   :  { %v2103_v23 = vld [vmem:[%s2639_s0 + $0x38] sm:$0xff]   ;;  %v2104_v24 = vld [vmem:[%s2639_s0 + $0x40] sm:$0xff]   ;;  %v2105_v25 = vld [vmem:[%s2639_s0 + $0x48] sm:$0xff]  }
  0x2f   :  { %1602 = vmatmul.mubr.msk.bf16.vlgmr.msra.gmra.mrb[0].mxu0 %vm210_vm0, %v2096_v5  ;;  %1815 = vmatpush3.bf16.msra.mxu1 %v2115_v11  ;;  %v2106_v26 = vld [vmem:[%s2639_s0 + $0x50] sm:$0xff]   ;;  %v2123_v27 = vld [vmem:[%s2642_s3 + $0x28] sm:$0xff]   ;;  %v2107_v28 = vld [vmem:[%s2639_s0 + $0x58] sm:$0xff]  }
  0x30   :  { %301 = vmatprep.mubr.bf16.mxu0 %v2220_v0  ;;  %1816 = vmatprep.subr.bf16.mxu1 %v2116_v12  ;;  %v2124_v29 = vld [vmem:[%s2642_s3 + $0x70] sm:$0xff]   ;;  %v2126_v31 = vld [vmem:[%s2642_s3 + $0x78] sm:$0xff]   ;;  %v2108_v33 = vld [vmem:[%s2639_s0 + $0x60] sm:$0xff]  }
  0x31   :  { %v2125_v30 = vld [vmem:[%s2642_s3 + $0x30] sm:$0xff]   ;;  %v2127_v32 = vld [vmem:[%s2642_s3 + $0x38] sm:$0xff]   ;;  %v2109_v34 = vld [vmem:[%s2639_s0 + $0x68] sm:$0xff]  }
  0x32   :  { %v2110_v35 = vld [vmem:[%s2639_s0 + $0x70] sm:$0xff]   ;;  %v2111_v36 = vld [vmem:[%s2639_s0 + $0x78] sm:$0xff]   ;;  %v98_v40 = vld [vmem:[%s2641_s2] sm:$0x3] }
  0x33   :  { %1817 = vmatpush3.bf16.msra.mxu1 %v2117_v13  ;;  %v2445_v42 = vrot.slane %v98_v40, %v102_v39  ;;  %v2447_v43 = vrot.slane %v98_v40, %v106_v41  ;;  %v2128_v51 = vld [vmem:[#allocation2] sm:$0xff]   ;;  %v2129_v52 = vld [vmem:[#allocation2 + $0x8] sm:$0xff]   ;;  %v2130_v59 = vld [vmem:[#allocation2 + $0x10] sm:$0xff]  }
  0x34   :  { %1818 = vmatprep.subr.bf16.mxu1 %v2118_v14  ;;  %1972 = vmatprep.subr.bf16.mxu0 %v2128_v51  ;;  %v2131_v4 = vld [vmem:[#allocation2 + $0x18] sm:$0xff]  }
  0x35   :  { %1973 = vmatpush3.bf16.msra.mxu0 %v2128_v51 }
  0x36   :  { %1974 = vmatprep.subr.bf16.mxu0 %v2129_v52 }
  0x37   :  { %1603 = vmatmul.mubr.msk.bf16.gmra.mrb[4].mxu0 %vm210_vm0, %v2097_v6  ;;  %1819 = vmatpush3.bf16.msra.mxu1 %v2119_v16 }
  0x38   :  { %311 = vmatprep.mubr.bf16.mxu0 %v2220_v0  ;;  %1820 = vmatprep.subr.bf16.mxu1 %v2120_v17 }
  0x39   :  { %1975 = vmatpush3.bf16.msra.mxu0 %v2129_v52 }
  0x3a   :  { %1976 = vmatprep.subr.bf16.mxu0 %v2130_v59 }
  0x3b   :  { %1821 = vmatpush3.bf16.msra.mxu1 %v2121_v18 }
  0x3c   :  { %1822 = vmatprep.subr.bf16.mxu1 %v2122_v19 }
  0x3d   :  { %1977 = vmatpush3.bf16.msra.mxu0 %v2130_v59 }
  0x3e   :  { %1978 = vmatprep.subr.bf16.mxu0 %v2131_v4 }
  0x3f   :  { %1604 = vmatmul.mubr.msk.bf16.gmra.mrb[8].mxu0 %vm210_vm0, %v2098_v8  ;;  %1823 = vmatpush3.bf16.msra.mxu1 %v2123_v27 }
  0x40   :  { %321 = vmatprep.mubr.bf16.mxu0 %v2220_v0  ;;  %1824 = vmatprep.subr.bf16.mxu1 %v2124_v29 }
  0x41   :  { %1979 = vmatpush3.bf16.msra.mxu0 %v2131_v4 }
  0x43   :  { %1825 = vmatpush3.bf16.msra.mxu1 %v2125_v30 }
  0x44   :  { %1826 = vmatprep.subr.bf16.mxu1 %v2126_v31 }
  0x47   :  { %1605 = vmatmul.mubr.msk.bf16.gmra.mrb[12].mxu0 %vm210_vm0, %v2099_v15  ;;  %1827 = vmatpush3.bf16.msra.mxu1 %v2127_v32 }
  0x48   :  { %331 = vmatprep.mubr.bf16.mxu0 %v2220_v0 }
  0x4f   :  { %1606 = vmatmul.mubr.msk.bf16.gmra.mrb[16].mxu0 %vm210_vm0, %v2100_v20 }
  0x50   :  { %341 = vmatprep.mubr.bf16.mxu0 %v2220_v0 }
  0x57   :  { %1607 = vmatmul.mubr.msk.bf16.gmra.mrb[20].mxu0 %vm210_vm0, %v2101_v21 }
  0x58   :  { %351 = vmatprep.mubr.bf16.mxu0 %v2220_v0 }
  0x5f   :  { %1608 = vmatmul.mubr.msk.bf16.gmra.mrb[24].mxu0 %vm210_vm0, %v2102_v22 }
  0x60   :  { %361 = vmatprep.mubr.bf16.mxu0 %v2220_v0 }
  0x67   :  { %1609 = vmatmul.mubr.msk.bf16.gmra.mrb[28].mxu0 %vm210_vm0, %v2103_v23 }
  0x68   :  { %371 = vmatprep.mubr.bf16.mxu0 %v2220_v0 }
  0x6f   :  { %1610 = vmatmul.mubr.msk.bf16.gmra.mrb[32].mxu0 %vm210_vm0, %v2104_v24 }
  0x70   :  { %381 = vmatprep.mubr.bf16.mxu0 %v2220_v0 }
  0x77   :  { %1611 = vmatmul.mubr.msk.bf16.gmra.mrb[36].mxu0 %vm210_vm0, %v2105_v25 }
  0x78   :  { %391 = vmatprep.mubr.bf16.mxu0 %v2220_v0 }
  0x7f   :  { %1612 = vmatmul.mubr.msk.bf16.gmra.mrb[40].mxu0 %vm210_vm0, %v2106_v26 }
  0x80   :  { %401 = vmatprep.mubr.bf16.mxu0 %v2220_v0 }
  0x87   :  { %1613 = vmatmul.mubr.msk.bf16.gmra.mrb[44].mxu0 %vm210_vm0, %v2107_v28 }
  0x88   :  { %411 = vmatprep.mubr.bf16.mxu0 %v2220_v0 }
  0x8f   :  { %1614 = vmatmul.mubr.msk.bf16.gmra.mrb[48].mxu0 %vm210_vm0, %v2108_v33 }
  0x90   :  { %421 = vmatprep.mubr.bf16.mxu0 %v2220_v0 }
  0x97   :  { %1615 = vmatmul.mubr.msk.bf16.gmra.mrb[52].mxu0 %vm210_vm0, %v2109_v34 }
  0x98   :  { %431 = vmatprep.mubr.bf16.mxu0 %v2220_v0 }
  0x9f   :  { %1616 = vmatmul.mubr.msk.bf16.gmra.mrb[56].mxu0 %vm210_vm0, %v2110_v35 }
  0xa0   :  { %441 = vmatprep.mubr.bf16.mxu0 %v2220_v0 }
  0xa7   :  { %1617 = vmatmul.mubr.msk.bf16.gmra.mrb[60].mxu0 %vm210_vm0, %v2111_v36 }
 0x102   :  { %v293_v44 = vpop.f32.mrb[0].mxu0 }
 0x103   :  { %v294_v45 = vadd.f32 %v293_v44, %v2445_v42  ;;  %v295_v46 = vpop.f32.mrb[1].mxu0 }
 0x104   :  { %v296_v47 = vadd.f32 %v295_v46, %v2447_v43  ;;  %v297_v48 = vpop.f32.mrb[2].mxu0 }
 0x105   :  { %v298_v49 = vadd.f32 %v297_v48, %v2445_v42  ;;  %v299_v50 = vpop.f32.mrb[3].mxu0  ;;  %v452_v54 = vmax.f32 %v294_v45, 0.0 }
 0x106   :  { %v300_v53 = vadd.f32 %v299_v50, %v2447_v43  ;;  %v453_v56 = vmax.f32 %v296_v47, 0.0 }
 0x107   :  { %v454_v55 = vmax.f32 %v298_v49, 0.0 }
 0x108   :  { %v455_v57 = vmax.f32 %v300_v53, 0.0 }
 0x109   :  { %v516_v58 = vpack.c.bf16 %v454_v55, %v452_v54 }
 0x10a   :  { %v303_v60 = vpop.f32.mrb[4].mxu0  ;;  %v517_v61 = vpack.c.bf16 %v455_v57, %v453_v56 }
 0x10b   :  { %v304_v62 = vadd.f32 %v303_v60, %v2445_v42  ;;  %v305_v63 = vpop.f32.mrb[5].mxu0 }
 0x10c   :  { %v306_v0 = vadd.f32 %v305_v63, %v2447_v43  ;;  %v307_v1 = vpop.f32.mrb[6].mxu0  ;;  %715 = vmatprep.mubr.bf16.mxu1 %v517_v61 }
 0x10d   :  { %v308_v2 = vadd.f32 %v307_v1, %v2445_v42  ;;  %v309_v3 = vpop.f32.mrb[7].mxu0  ;;  %716 = vmatmul.mubr.bf16.vlgmr.msra.gmra.mrb[0].mxu1 %v516_v58  ;;  %v456_v6 = vmax.f32 %v304_v62, 0.0 }
 0x10e   :  { %v310_v5 = vadd.f32 %v309_v3, %v2447_v43  ;;  %v457_v8 = vmax.f32 %v306_v0, 0.0 }
 0x10f   :  { %v458_v7 = vmax.f32 %v308_v2, 0.0 }
 0x110   :  { %v459_v9 = vmax.f32 %v310_v5, 0.0 }
 0x111   :  { %v518_v10 = vpack.c.bf16 %v458_v7, %v456_v6 }
 0x112   :  { %v519_v11 = vpack.c.bf16 %v459_v9, %v457_v8  ;;  %v313_v12 = vpop.f32.mrb[8].mxu0 }
 0x113   :  { %v314_v13 = vadd.f32 %v313_v12, %v2445_v42  ;;  %v315_v14 = vpop.f32.mrb[9].mxu0 }
 0x114   :  { %v316_v15 = vadd.f32 %v315_v14, %v2447_v43  ;;  %v317_v16 = vpop.f32.mrb[10].mxu0  ;;  %723 = vmatprep.mubr.bf16.mxu1 %v519_v11 }
 0x115   :  { %v318_v17 = vadd.f32 %v317_v16, %v2445_v42  ;;  %v319_v18 = vpop.f32.mrb[11].mxu0  ;;  %724 = vmatmul.mubr.bf16.gmra.mrb[4].mxu1 %v518_v10  ;;  %v460_v20 = vmax.f32 %v314_v13, 0.0 }
 0x116   :  { %v320_v19 = vadd.f32 %v319_v18, %v2447_v43  ;;  %v461_v22 = vmax.f32 %v316_v15, 0.0 }
 0x117   :  { %v462_v21 = vmax.f32 %v318_v17, 0.0 }
 0x118   :  { %v463_v23 = vmax.f32 %v320_v19, 0.0 }
 0x119   :  { %v520_v24 = vpack.c.bf16 %v462_v21, %v460_v20 }
 0x11a   :  { %v521_v25 = vpack.c.bf16 %v463_v23, %v461_v22  ;;  %v323_v26 = vpop.f32.mrb[12].mxu0 }
 0x11b   :  { %v324_v27 = vadd.f32 %v323_v26, %v2445_v42  ;;  %v325_v28 = vpop.f32.mrb[13].mxu0 }
 0x11c   :  { %v326_v29 = vadd.f32 %v325_v28, %v2447_v43  ;;  %v327_v30 = vpop.f32.mrb[14].mxu0  ;;  %731 = vmatprep.mubr.bf16.mxu1 %v521_v25 }
 0x11d   :  { %v328_v31 = vadd.f32 %v327_v30, %v2445_v42  ;;  %v329_v32 = vpop.f32.mrb[15].mxu0  ;;  %732 = vmatmul.mubr.bf16.gmra.mrb[8].mxu1 %v520_v24  ;;  %v464_v34 = vmax.f32 %v324_v27, 0.0 }
 0x11e   :  { %v330_v33 = vadd.f32 %v329_v32, %v2447_v43  ;;  %v465_v36 = vmax.f32 %v326_v29, 0.0 }
 0x11f   :  { %v466_v35 = vmax.f32 %v328_v31, 0.0 }
 0x120   :  { %v467_v37 = vmax.f32 %v330_v33, 0.0 }
 0x121   :  { %v522_v38 = vpack.c.bf16 %v466_v35, %v464_v34 }
 0x122   :  { %v523_v39 = vpack.c.bf16 %v467_v37, %v465_v36  ;;  %v333_v40 = vpop.f32.mrb[16].mxu0 }
 0x123   :  { %v334_v41 = vadd.f32 %v333_v40, %v2445_v42  ;;  %v335_v44 = vpop.f32.mrb[17].mxu0 }
 0x124   :  { %v336_v45 = vadd.f32 %v335_v44, %v2447_v43  ;;  %v337_v46 = vpop.f32.mrb[18].mxu0  ;;  %739 = vmatprep.mubr.bf16.mxu1 %v523_v39 }
 0x125   :  { %v338_v47 = vadd.f32 %v337_v46, %v2445_v42  ;;  %v339_v48 = vpop.f32.mrb[19].mxu0  ;;  %740 = vmatmul.mubr.bf16.gmra.mrb[12].mxu1 %v522_v38  ;;  %v468_v50 = vmax.f32 %v334_v41, 0.0 }
 0x126   :  { %v340_v49 = vadd.f32 %v339_v48, %v2447_v43  ;;  %v469_v52 = vmax.f32 %v336_v45, 0.0 }
 0x127   :  { %v470_v51 = vmax.f32 %v338_v47, 0.0 }
 0x128   :  { %v471_v53 = vmax.f32 %v340_v49, 0.0 }
 0x129   :  { %v524_v54 = vpack.c.bf16 %v470_v51, %v468_v50 }
 0x12a   :  { %v525_v55 = vpack.c.bf16 %v471_v53, %v469_v52  ;;  %v343_v56 = vpop.f32.mrb[20].mxu0 }
 0x12b   :  { %v344_v57 = vadd.f32 %v343_v56, %v2445_v42  ;;  %v345_v58 = vpop.f32.mrb[21].mxu0 }
 0x12c   :  { %v346_v59 = vadd.f32 %v345_v58, %v2447_v43  ;;  %v347_v60 = vpop.f32.mrb[22].mxu0  ;;  %747 = vmatprep.mubr.bf16.mxu1 %v525_v55 }
 0x12d   :  { %v348_v61 = vadd.f32 %v347_v60, %v2445_v42  ;;  %v349_v62 = vpop.f32.mrb[23].mxu0  ;;  %748 = vmatmul.mubr.bf16.gmra.mrb[16].mxu1 %v524_v54  ;;  %v472_v0 = vmax.f32 %v344_v57, 0.0 }
 0x12e   :  { %v350_v63 = vadd.f32 %v349_v62, %v2447_v43  ;;  %v473_v2 = vmax.f32 %v346_v59, 0.0 }
 0x12f   :  { %v474_v1 = vmax.f32 %v348_v61, 0.0 }
 0x130   :  { %v475_v3 = vmax.f32 %v350_v63, 0.0 }
 0x131   :  { %v526_v4 = vpack.c.bf16 %v474_v1, %v472_v0 }
 0x132   :  { %v527_v5 = vpack.c.bf16 %v475_v3, %v473_v2  ;;  %v353_v6 = vpop.f32.mrb[24].mxu0 }
 0x133   :  { %v354_v7 = vadd.f32 %v353_v6, %v2445_v42  ;;  %v355_v8 = vpop.f32.mrb[25].mxu0 }
 0x134   :  { %v356_v9 = vadd.f32 %v355_v8, %v2447_v43  ;;  %v357_v10 = vpop.f32.mrb[26].mxu0  ;;  %755 = vmatprep.mubr.bf16.mxu1 %v527_v5 }
 0x135   :  { %v358_v11 = vadd.f32 %v357_v10, %v2445_v42  ;;  %v359_v12 = vpop.f32.mrb[27].mxu0  ;;  %756 = vmatmul.mubr.bf16.gmra.mrb[20].mxu1 %v526_v4  ;;  %v476_v14 = vmax.f32 %v354_v7, 0.0 }
 0x136   :  { %v360_v13 = vadd.f32 %v359_v12, %v2447_v43  ;;  %v477_v16 = vmax.f32 %v356_v9, 0.0 }
 0x137   :  { %v478_v15 = vmax.f32 %v358_v11, 0.0 }
 0x138   :  { %v479_v17 = vmax.f32 %v360_v13, 0.0 }
 0x139   :  { %v528_v18 = vpack.c.bf16 %v478_v15, %v476_v14 }
 0x13a   :  { %v529_v19 = vpack.c.bf16 %v479_v17, %v477_v16  ;;  %v363_v20 = vpop.f32.mrb[28].mxu0 }
 0x13b   :  { %v364_v21 = vadd.f32 %v363_v20, %v2445_v42  ;;  %v365_v22 = vpop.f32.mrb[29].mxu0 }
 0x13c   :  { %v366_v23 = vadd.f32 %v365_v22, %v2447_v43  ;;  %v367_v24 = vpop.f32.mrb[30].mxu0  ;;  %763 = vmatprep.mubr.bf16.mxu1 %v529_v19 }
 0x13d   :  { %v368_v25 = vadd.f32 %v367_v24, %v2445_v42  ;;  %v369_v26 = vpop.f32.mrb[31].mxu0  ;;  %764 = vmatmul.mubr.bf16.gmra.mrb[24].mxu1 %v528_v18  ;;  %v480_v28 = vmax.f32 %v364_v21, 0.0 }
 0x13e   :  { %v370_v27 = vadd.f32 %v369_v26, %v2447_v43  ;;  %v481_v30 = vmax.f32 %v366_v23, 0.0 }
 0x13f   :  { %v482_v29 = vmax.f32 %v368_v25, 0.0 }
 0x140   :  { %v483_v31 = vmax.f32 %v370_v27, 0.0 }
 0x141   :  { %v530_v32 = vpack.c.bf16 %v482_v29, %v480_v28  ;;  %v2132_v29 = vld [vmem:[#allocation2 + $0x20] sm:$0xff]  }
 0x142   :  { %v531_v33 = vpack.c.bf16 %v483_v31, %v481_v30  ;;  %v373_v34 = vpop.f32.mrb[32].mxu0  ;;  %1980 = vmatprep.subr.bf16.mxu0 %v2132_v29 }
 0x143   :  { %v374_v35 = vadd.f32 %v373_v34, %v2445_v42  ;;  %v375_v36 = vpop.f32.mrb[33].mxu0  ;;  %1981 = vmatpush3.bf16.msra.mxu0 %v2132_v29 }
 0x144   :  { %v376_v37 = vadd.f32 %v375_v36, %v2447_v43  ;;  %v377_v38 = vpop.f32.mrb[34].mxu0  ;;  %771 = vmatprep.mubr.bf16.mxu1 %v531_v33 }
 0x145   :  { %v378_v39 = vadd.f32 %v377_v38, %v2445_v42  ;;  %v379_v40 = vpop.f32.mrb[35].mxu0  ;;  %772 = vmatmul.mubr.bf16.gmra.mrb[28].mxu1 %v530_v32  ;;  %v484_v44 = vmax.f32 %v374_v35, 0.0 }
 0x146   :  { %v380_v41 = vadd.f32 %v379_v40, %v2447_v43  ;;  %v485_v46 = vmax.f32 %v376_v37, 0.0  ;;  %v2133_v37 = vld [vmem:[#allocation2 + $0x28] sm:$0xff]  }
 0x147   :  { %v486_v45 = vmax.f32 %v378_v39, 0.0  ;;  %1982 = vmatprep.subr.bf16.mxu0 %v2133_v37 }
 0x148   :  { %v487_v47 = vmax.f32 %v380_v41, 0.0  ;;  %1983 = vmatpush3.bf16.msra.mxu0 %v2133_v37 }
 0x149   :  { %v532_v48 = vpack.c.bf16 %v486_v45, %v484_v44 }
 0x14a   :  { %v533_v49 = vpack.c.bf16 %v487_v47, %v485_v46  ;;  %v383_v50 = vpop.f32.mrb[36].mxu0  ;;  %v2134_v47 = vld [vmem:[#allocation2 + $0x30] sm:$0xff]  }
 0x14b   :  { %v384_v51 = vadd.f32 %v383_v50, %v2445_v42  ;;  %v385_v52 = vpop.f32.mrb[37].mxu0  ;;  %1984 = vmatprep.subr.bf16.mxu0 %v2134_v47 }
 0x14c   :  { %v386_v53 = vadd.f32 %v385_v52, %v2447_v43  ;;  %v387_v54 = vpop.f32.mrb[38].mxu0  ;;  %779 = vmatprep.mubr.bf16.mxu1 %v533_v49  ;;  %1985 = vmatpush3.bf16.msra.mxu0 %v2134_v47 }
 0x14d   :  { %v388_v55 = vadd.f32 %v387_v54, %v2445_v42  ;;  %v389_v56 = vpop.f32.mrb[39].mxu0  ;;  %780 = vmatmul.mubr.bf16.gmra.mrb[32].mxu1 %v532_v48  ;;  %v488_v58 = vmax.f32 %v384_v51, 0.0 }
 0x14e   :  { %v390_v57 = vadd.f32 %v389_v56, %v2447_v43  ;;  %v489_v60 = vmax.f32 %v386_v53, 0.0 }
 0x14f   :  { %v490_v59 = vmax.f32 %v388_v55, 0.0  ;;  %v2135_v55 = vld [vmem:[#allocation2 + $0x38] sm:$0xff]  }
 0x150   :  { %v491_v61 = vmax.f32 %v390_v57, 0.0  ;;  %1986 = vmatprep.subr.bf16.mxu0 %v2135_v55 }
 0x151   :  { %v534_v62 = vpack.c.bf16 %v490_v59, %v488_v58  ;;  %1987 = vmatpush3.bf16.msra.mxu0 %v2135_v55 }
 0x152   :  { %v535_v63 = vpack.c.bf16 %v491_v61, %v489_v60  ;;  %v393_v0 = vpop.f32.mrb[40].mxu0 }
 0x153   :  { %v394_v1 = vadd.f32 %v393_v0, %v2445_v42  ;;  %v395_v2 = vpop.f32.mrb[41].mxu0 }
 0x154   :  { %v396_v3 = vadd.f32 %v395_v2, %v2447_v43  ;;  %v397_v4 = vpop.f32.mrb[42].mxu0  ;;  %787 = vmatprep.mubr.bf16.mxu1 %v535_v63 }
 0x155   :  { %v398_v5 = vadd.f32 %v397_v4, %v2445_v42  ;;  %v399_v6 = vpop.f32.mrb[43].mxu0  ;;  %788 = vmatmul.mubr.bf16.gmra.mrb[36].mxu1 %v534_v62  ;;  %v492_v8 = vmax.f32 %v394_v1, 0.0 }
 0x156   :  { %v400_v7 = vadd.f32 %v399_v6, %v2447_v43  ;;  %v493_v10 = vmax.f32 %v396_v3, 0.0 }
 0x157   :  { %v494_v9 = vmax.f32 %v398_v5, 0.0 }
 0x158   :  { %v495_v11 = vmax.f32 %v400_v7, 0.0 }
 0x159   :  { %v536_v12 = vpack.c.bf16 %v494_v9, %v492_v8 }
 0x15a   :  { %v537_v13 = vpack.c.bf16 %v495_v11, %v493_v10  ;;  %v403_v14 = vpop.f32.mrb[44].mxu0 }
 0x15b   :  { %v404_v15 = vadd.f32 %v403_v14, %v2445_v42  ;;  %v405_v16 = vpop.f32.mrb[45].mxu0 }
 0x15c   :  { %v406_v17 = vadd.f32 %v405_v16, %v2447_v43  ;;  %v407_v18 = vpop.f32.mrb[46].mxu0  ;;  %795 = vmatprep.mubr.bf16.mxu1 %v537_v13 }
 0x15d   :  { %v408_v19 = vadd.f32 %v407_v18, %v2445_v42  ;;  %v409_v20 = vpop.f32.mrb[47].mxu0  ;;  %796 = vmatmul.mubr.bf16.gmra.mrb[40].mxu1 %v536_v12  ;;  %v496_v22 = vmax.f32 %v404_v15, 0.0 }
 0x15e   :  { %v410_v21 = vadd.f32 %v409_v20, %v2447_v43  ;;  %v497_v24 = vmax.f32 %v406_v17, 0.0 }
 0x15f   :  { %v498_v23 = vmax.f32 %v408_v19, 0.0 }
 0x160   :  { %v499_v25 = vmax.f32 %v410_v21, 0.0 }
 0x161   :  { %v538_v26 = vpack.c.bf16 %v498_v23, %v496_v22 }
 0x162   :  { %v539_v27 = vpack.c.bf16 %v499_v25, %v497_v24  ;;  %v413_v28 = vpop.f32.mrb[48].mxu0 }
 0x163   :  { %v414_v30 = vadd.f32 %v413_v28, %v2445_v42  ;;  %v415_v31 = vpop.f32.mrb[49].mxu0 }
 0x164   :  { %v416_v32 = vadd.f32 %v415_v31, %v2447_v43  ;;  %v417_v33 = vpop.f32.mrb[50].mxu0  ;;  %803 = vmatprep.mubr.bf16.mxu1 %v539_v27  ;;  %v2516_v27 = vld [vmem:[%s2643_s4] ss:$0 sm:$0xff] }
 0x165   :  { %v418_v34 = vadd.f32 %v417_v33, %v2445_v42  ;;  %v419_v35 = vpop.f32.mrb[51].mxu0  ;;  %804 = vmatmul.mubr.bf16.gmra.mrb[44].mxu1 %v538_v26  ;;  %v500_v38 = vmax.f32 %v414_v30, 0.0 }
 0x166   :  { %v420_v36 = vadd.f32 %v419_v35, %v2447_v43  ;;  %v501_v40 = vmax.f32 %v416_v32, 0.0  ;;  %v2136_v32 = vld [vmem:[#allocation5] sm:$0xff]  }
 0x167   :  { %v502_v39 = vmax.f32 %v418_v34, 0.0  ;;  %2068 = vmatprep.subr.bf16.mxu1 %v2136_v32  ;;  %v2137_v34 = vld [vmem:[#allocation5 + $0x8] sm:$0xff]   ;;  %2020 = vmatprep.subr.bf16.mxu0 %v2136_v32 }
 0x168   :  { %v503_v41 = vmax.f32 %v420_v36, 0.0  ;;  %2076 = vmatpush3.bf16.msra.mxu1 %v2136_v32 }
 0x169   :  { %v540_v44 = vpack.c.bf16 %v502_v39, %v500_v38  ;;  %2069 = vmatprep.subr.bf16.mxu1 %v2137_v34 }
 0x16a   :  { %v541_v45 = vpack.c.bf16 %v503_v41, %v501_v40  ;;  %v423_v46 = vpop.f32.mrb[52].mxu0 }
 0x16b   :  { %v424_v48 = vadd.f32 %v423_v46, %v2445_v42  ;;  %v425_v49 = vpop.f32.mrb[53].mxu0 }
 0x16c   :  { %v426_v50 = vadd.f32 %v425_v49, %v2447_v43  ;;  %v427_v51 = vpop.f32.mrb[54].mxu0  ;;  %811 = vmatprep.mubr.bf16.mxu1 %v541_v45  ;;  %2077 = vmatpush3.bf16.msra.mxu1 %v2137_v34  ;;  %v2139_v49 = vld [vmem:[#allocation5 + $0x18] sm:$0xff]  }
 0x16d   :  { %v428_v52 = vadd.f32 %v427_v51, %v2445_v42  ;;  %v429_v53 = vpop.f32.mrb[55].mxu0  ;;  %812 = vmatmul.mubr.bf16.gmra.mrb[48].mxu1 %v540_v44  ;;  %v504_v56 = vmax.f32 %v424_v48, 0.0  ;;  %v2138_v44 = vld [vmem:[#allocation5 + $0x10] sm:$0xff]  }
 0x16e   :  { %v430_v54 = vadd.f32 %v429_v53, %v2447_v43  ;;  %v505_v58 = vmax.f32 %v426_v50, 0.0  ;;  %2070 = vmatprep.subr.bf16.mxu1 %v2138_v44 }
 0x16f   :  { %v506_v57 = vmax.f32 %v428_v52, 0.0 }
 0x170   :  { %v507_v59 = vmax.f32 %v430_v54, 0.0  ;;  %2078 = vmatpush3.bf16.msra.mxu1 %v2138_v44 }
 0x171   :  { %v542_v60 = vpack.c.bf16 %v506_v57, %v504_v56  ;;  %2071 = vmatprep.subr.bf16.mxu1 %v2139_v49  ;;  %v2140_v57 = vld [vmem:[#allocation5 + $0x20] sm:$0xff]  }
 0x172   :  { %v543_v61 = vpack.c.bf16 %v507_v59, %v505_v58  ;;  %v433_v62 = vpop.f32.mrb[56].mxu0 }
 0x173   :  { %v434_v63 = vadd.f32 %v433_v62, %v2445_v42  ;;  %v435_v0 = vpop.f32.mrb[57].mxu0  ;;  %v2141_v62 = vld [vmem:[#allocation5 + $0x28] sm:$0xff]  }
 0x174   :  { %v436_v1 = vadd.f32 %v435_v0, %v2447_v43  ;;  %v437_v2 = vpop.f32.mrb[58].mxu0  ;;  %819 = vmatprep.mubr.bf16.mxu1 %v543_v61  ;;  %2079 = vmatpush3.bf16.msra.mxu1 %v2139_v49 }
 0x175   :  { %v438_v3 = vadd.f32 %v437_v2, %v2445_v42  ;;  %v439_v4 = vpop.f32.mrb[59].mxu0  ;;  %820 = vmatmul.mubr.bf16.gmra.mrb[52].mxu1 %v542_v60  ;;  %v508_v6 = vmax.f32 %v434_v63, 0.0  ;;  %2072 = vmatprep.subr.bf16.mxu1 %v2140_v57 }
 0x176   :  { %v440_v5 = vadd.f32 %v439_v4, %v2447_v43  ;;  %v509_v8 = vmax.f32 %v436_v1, 0.0 }
 0x177   :  { %v510_v7 = vmax.f32 %v438_v3, 0.0 }
 0x178   :  { %v511_v9 = vmax.f32 %v440_v5, 0.0  ;;  %2080 = vmatpush3.bf16.msra.mxu1 %v2140_v57 }
 0x179   :  { %v544_v10 = vpack.c.bf16 %v510_v7, %v508_v6  ;;  %2073 = vmatprep.subr.bf16.mxu1 %v2141_v62 }
 0x17a   :  { %v545_v11 = vpack.c.bf16 %v511_v9, %v509_v8  ;;  %v443_v12 = vpop.f32.mrb[60].mxu0 }
 0x17b   :  { %v444_v13 = vadd.f32 %v443_v12, %v2445_v42  ;;  %v445_v14 = vpop.f32.mrb[61].mxu0 }
 0x17c   :  { %v446_v15 = vadd.f32 %v445_v14, %v2447_v43  ;;  %v447_v16 = vpop.f32.mrb[62].mxu0  ;;  %827 = vmatprep.mubr.bf16.mxu1 %v545_v11  ;;  %2081 = vmatpush3.bf16.msra.mxu1 %v2141_v62 }
 0x17d   :  { %v448_v17 = vadd.f32 %v447_v16, %v2445_v42  ;;  %v449_v18 = vpop.f32.mrb[63].mxu0  ;;  %828 = vmatmul.mubr.bf16.gmra.mrb[56].mxu1 %v544_v10  ;;  %v512_v20 = vmax.f32 %v444_v13, 0.0 }
 0x17e   :  { %v450_v19 = vadd.f32 %v449_v18, %v2447_v43  ;;  %v513_v22 = vmax.f32 %v446_v15, 0.0 }
 0x17f   :  { %v514_v21 = vmax.f32 %v448_v17, 0.0 }
 0x180   :  { %v515_v23 = vmax.f32 %v450_v19, 0.0 }
 0x181   :  { %v546_v24 = vpack.c.bf16 %v514_v21, %v512_v20 }
 0x182   :  { %v547_v25 = vpack.c.bf16 %v515_v23, %v513_v22 }
 0x184   :  { %835 = vmatprep.mubr.bf16.mxu1 %v547_v25 }
 0x185   :  { %836 = vmatmul.mubr.bf16.gmra.mrb[60].mxu1 %v546_v24 }
 0x1e0   :  { %v1828_v26 = vpop.f32.mrb[0].mxu1 }
 0x1e1   :  { %v1829_v28 = vpop.f32.mrb[1].mxu1 }
 0x1e2   :  { %v1830_v42 = vadd.f32 %v1829_v28, %v1828_v26  ;;  %v1831_v29 = vpop.f32.mrb[2].mxu1 }
 0x1e3   :  { %v1832_v30 = vpop.f32.mrb[3].mxu1 }
 0x1e4   :  { %v718_v43 = vadd.f32 %v1830_v42, %v2516_v27  ;;  %v1833_v31 = vadd.f32 %v1832_v30, %v1831_v29 }
 0x1e6   :  { %v721_v33 = vadd.f32 %v1833_v31, %v2516_v27  ;;  %v844_v35 = vmax.f32 %v718_v43, 0.0 }
 0x1e8   :  { %v845_v36 = vmax.f32 %v721_v33, 0.0  ;;  %v1834_v37 = vpop.f32.mrb[4].mxu1 }
 0x1e9   :  { %v1835_v38 = vpop.f32.mrb[5].mxu1 }
 0x1ea   :  { %v1836_v39 = vadd.f32 %v1835_v38, %v1834_v37  ;;  %v1837_v40 = vpop.f32.mrb[6].mxu1  ;;  %v876_v41 = vpack.c.bf16 %v845_v36, %v844_v35 }
 0x1eb   :  { %v1838_v45 = vpop.f32.mrb[7].mxu1 }
 0x1ec   :  { %v726_v46 = vadd.f32 %v1836_v39, %v2516_v27  ;;  %v1839_v47 = vadd.f32 %v1838_v45, %v1837_v40  ;;  %1988 = vmatprep.mubr.bf16.mxu0 %v876_v41 }
 0x1ee   :  { %v729_v48 = vadd.f32 %v1839_v47, %v2516_v27  ;;  %v846_v50 = vmax.f32 %v726_v46, 0.0 }
 0x1f0   :  { %v847_v51 = vmax.f32 %v729_v48, 0.0  ;;  %v1840_v52 = vpop.f32.mrb[8].mxu1 }
 0x1f1   :  { %v1841_v53 = vpop.f32.mrb[9].mxu1 }
 0x1f2   :  { %v877_v54 = vpack.c.bf16 %v847_v51, %v846_v50  ;;  %v1842_v55 = vadd.f32 %v1841_v53, %v1840_v52  ;;  %v1843_v56 = vpop.f32.mrb[10].mxu1 }
 0x1f3   :  { %v1844_v58 = vpop.f32.mrb[11].mxu1 }
 0x1f4   :  { %v734_v59 = vadd.f32 %v1842_v55, %v2516_v27  ;;  %v1845_v60 = vadd.f32 %v1844_v58, %v1843_v56  ;;  %1989 = vmatmul.mubr.bf16.vlgmr.msra.gmra.mrb[64].mxu0 %v877_v54 }
 0x1f5   :  { %2021 = vmatpush3.bf16.msra.mxu0 %v2136_v32 }
 0x1f6   :  { %v737_v61 = vadd.f32 %v1845_v60, %v2516_v27  ;;  %2022 = vmatprep.subr.bf16.mxu0 %v2137_v34  ;;  %v848_v63 = vmax.f32 %v734_v59, 0.0 }
 0x1f8   :  { %v849_v0 = vmax.f32 %v737_v61, 0.0  ;;  %v1846_v1 = vpop.f32.mrb[12].mxu1 }
 0x1f9   :  { %v1847_v2 = vpop.f32.mrb[13].mxu1  ;;  %2023 = vmatpush3.bf16.msra.mxu0 %v2137_v34 }
 0x1fa   :  { %v1848_v3 = vadd.f32 %v1847_v2, %v1846_v1  ;;  %v1849_v4 = vpop.f32.mrb[14].mxu1  ;;  %v878_v5 = vpack.c.bf16 %v849_v0, %v848_v63  ;;  %2024 = vmatprep.subr.bf16.mxu0 %v2138_v44 }
 0x1fb   :  { %v1850_v6 = vpop.f32.mrb[15].mxu1 }
 0x1fc   :  { %v742_v7 = vadd.f32 %v1848_v3, %v2516_v27  ;;  %v1851_v8 = vadd.f32 %v1850_v6, %v1849_v4  ;;  %1992 = vmatprep.mubr.bf16.mxu0 %v878_v5 }
 0x1fd   :  { %2025 = vmatpush3.bf16.msra.mxu0 %v2138_v44 }
 0x1fe   :  { %v745_v9 = vadd.f32 %v1851_v8, %v2516_v27  ;;  %2026 = vmatprep.subr.bf16.mxu0 %v2139_v49  ;;  %v850_v10 = vmax.f32 %v742_v7, 0.0 }
 0x200   :  { %v851_v11 = vmax.f32 %v745_v9, 0.0  ;;  %v1852_v12 = vpop.f32.mrb[16].mxu1 }
 0x201   :  { %v1853_v13 = vpop.f32.mrb[17].mxu1  ;;  %2027 = vmatpush3.bf16.msra.mxu0 %v2139_v49 }
 0x202   :  { %v1854_v14 = vadd.f32 %v1853_v13, %v1852_v12  ;;  %v1855_v15 = vpop.f32.mrb[18].mxu1  ;;  %v879_v16 = vpack.c.bf16 %v851_v11, %v850_v10  ;;  %2028 = vmatprep.subr.bf16.mxu0 %v2140_v57 }
 0x203   :  { %v1856_v17 = vpop.f32.mrb[19].mxu1 }
 0x204   :  { %v750_v18 = vadd.f32 %v1854_v14, %v2516_v27  ;;  %v1857_v19 = vadd.f32 %v1856_v17, %v1855_v15  ;;  %1993 = vmatmul.mubr.bf16.gmra.mrb[68].mxu0 %v879_v16 }
 0x205   :  { %2029 = vmatpush3.bf16.msra.mxu0 %v2140_v57 }
 0x206   :  { %v753_v20 = vadd.f32 %v1857_v19, %v2516_v27  ;;  %2030 = vmatprep.subr.bf16.mxu0 %v2141_v62  ;;  %v852_v21 = vmax.f32 %v750_v18, 0.0 }
 0x208   :  { %v853_v22 = vmax.f32 %v753_v20, 0.0  ;;  %v1858_v23 = vpop.f32.mrb[20].mxu1 }
 0x209   :  { %v1859_v24 = vpop.f32.mrb[21].mxu1  ;;  %2031 = vmatpush3.bf16.msra.mxu0 %v2141_v62 }
 0x20a   :  { %v1860_v25 = vadd.f32 %v1859_v24, %v1858_v23  ;;  %v1861_v26 = vpop.f32.mrb[22].mxu1  ;;  %v880_v28 = vpack.c.bf16 %v853_v22, %v852_v21 }
 0x20b   :  { %v1862_v42 = vpop.f32.mrb[23].mxu1 }
 0x20c   :  { %v758_v29 = vadd.f32 %v1860_v25, %v2516_v27  ;;  %v1863_v30 = vadd.f32 %v1862_v42, %v1861_v26  ;;  %1996 = vmatprep.mubr.bf16.mxu0 %v880_v28 }
 0x20e   :  { %v761_v43 = vadd.f32 %v1863_v30, %v2516_v27  ;;  %v854_v31 = vmax.f32 %v758_v29, 0.0 }
 0x210   :  { %v855_v32 = vmax.f32 %v761_v43, 0.0  ;;  %v1864_v33 = vpop.f32.mrb[24].mxu1 }
 0x211   :  { %v1865_v34 = vpop.f32.mrb[25].mxu1 }
 0x212   :  { %v1866_v35 = vadd.f32 %v1865_v34, %v1864_v33  ;;  %v1867_v36 = vpop.f32.mrb[26].mxu1  ;;  %v881_v37 = vpack.c.bf16 %v855_v32, %v854_v31 }
 0x213   :  { %v1868_v38 = vpop.f32.mrb[27].mxu1 }
 0x214   :  { %v766_v39 = vadd.f32 %v1866_v35, %v2516_v27  ;;  %v1869_v40 = vadd.f32 %v1868_v38, %v1867_v36  ;;  %1997 = vmatmul.mubr.bf16.gmra.mrb[72].mxu0 %v881_v37 }
 0x216   :  { %v769_v41 = vadd.f32 %v1869_v40, %v2516_v27  ;;  %v856_v44 = vmax.f32 %v766_v39, 0.0 }
 0x218   :  { %v857_v45 = vmax.f32 %v769_v41, 0.0  ;;  %v1870_v46 = vpop.f32.mrb[28].mxu1 }
 0x219   :  { %v1871_v47 = vpop.f32.mrb[29].mxu1 }
 0x21a   :  { %v1872_v48 = vadd.f32 %v1871_v47, %v1870_v46  ;;  %v1873_v49 = vpop.f32.mrb[30].mxu1  ;;  %v882_v50 = vpack.c.bf16 %v857_v45, %v856_v44 }
 0x21b   :  { %v1874_v51 = vpop.f32.mrb[31].mxu1 }
 0x21c   :  { %v774_v52 = vadd.f32 %v1872_v48, %v2516_v27  ;;  %v1875_v53 = vadd.f32 %v1874_v51, %v1873_v49  ;;  %2000 = vmatprep.mubr.bf16.mxu0 %v882_v50  ;;  %v2142_v50 = vld [vmem:[#allocation5 + $0x30] sm:$0xff]  }
 0x21d   :  { %2032 = vmatprep.subr.bf16.mxu0 %v2142_v50  ;;  %2074 = vmatprep.subr.bf16.mxu1 %v2142_v50 }
 0x21e   :  { %v777_v54 = vadd.f32 %v1875_v53, %v2516_v27  ;;  %v858_v55 = vmax.f32 %v774_v52, 0.0  ;;  %2033 = vmatpush3.bf16.msra.mxu0 %v2142_v50  ;;  %2082 = vmatpush3.bf16.msra.mxu1 %v2142_v50 }
 0x220   :  { %v859_v56 = vmax.f32 %v777_v54, 0.0  ;;  %v1876_v57 = vpop.f32.mrb[32].mxu1 }
 0x221   :  { %v1877_v58 = vpop.f32.mrb[33].mxu1 }
 0x222   :  { %v1878_v59 = vadd.f32 %v1877_v58, %v1876_v57  ;;  %v1879_v60 = vpop.f32.mrb[34].mxu1  ;;  %v883_v61 = vpack.c.bf16 %v859_v56, %v858_v55  ;;  %v2143_v58 = vld [vmem:[#allocation5 + $0x38] sm:$0xff]  }
 0x223   :  { %v1880_v62 = vpop.f32.mrb[35].mxu1  ;;  %2034 = vmatprep.subr.bf16.mxu0 %v2143_v58  ;;  %2075 = vmatprep.subr.bf16.mxu1 %v2143_v58 }
 0x224   :  { %v782_v63 = vadd.f32 %v1878_v59, %v2516_v27  ;;  %v1881_v0 = vadd.f32 %v1880_v62, %v1879_v60  ;;  %2001 = vmatmul.mubr.bf16.gmra.mrb[76].mxu0 %v883_v61  ;;  %2083 = vmatpush3.bf16.msra.mxu1 %v2143_v58 }
 0x225   :  { %2035 = vmatpush3.bf16.msra.mxu0 %v2143_v58 }
 0x226   :  { %v785_v1 = vadd.f32 %v1881_v0, %v2516_v27  ;;  %v860_v2 = vmax.f32 %v782_v63, 0.0 }
 0x228   :  { %v861_v3 = vmax.f32 %v785_v1, 0.0  ;;  %v1882_v4 = vpop.f32.mrb[36].mxu1 }
 0x229   :  { %v1883_v5 = vpop.f32.mrb[37].mxu1 }
 0x22a   :  { %v1884_v6 = vadd.f32 %v1883_v5, %v1882_v4  ;;  %v1885_v7 = vpop.f32.mrb[38].mxu1  ;;  %v884_v8 = vpack.c.bf16 %v861_v3, %v860_v2 }
 0x22b   :  { %v1886_v9 = vpop.f32.mrb[39].mxu1 }
 0x22c   :  { %v790_v10 = vadd.f32 %v1884_v6, %v2516_v27  ;;  %v1887_v11 = vadd.f32 %v1886_v9, %v1885_v7  ;;  %2004 = vmatprep.mubr.bf16.mxu0 %v884_v8 }
 0x22e   :  { %v793_v12 = vadd.f32 %v1887_v11, %v2516_v27  ;;  %v862_v13 = vmax.f32 %v790_v10, 0.0 }
 0x230   :  { %v863_v14 = vmax.f32 %v793_v12, 0.0  ;;  %v1888_v15 = vpop.f32.mrb[40].mxu1 }
 0x231   :  { %v1889_v16 = vpop.f32.mrb[41].mxu1 }
 0x232   :  { %v1890_v17 = vadd.f32 %v1889_v16, %v1888_v15  ;;  %v1891_v18 = vpop.f32.mrb[42].mxu1  ;;  %v885_v19 = vpack.c.bf16 %v863_v14, %v862_v13 }
 0x233   :  { %v1892_v20 = vpop.f32.mrb[43].mxu1 }
 0x234   :  { %v798_v21 = vadd.f32 %v1890_v17, %v2516_v27  ;;  %v1893_v22 = vadd.f32 %v1892_v20, %v1891_v18  ;;  %2005 = vmatmul.mubr.bf16.gmra.mrb[80].mxu0 %v885_v19 }
 0x236   :  { %v801_v23 = vadd.f32 %v1893_v22, %v2516_v27  ;;  %v864_v24 = vmax.f32 %v798_v21, 0.0  ;;  %v2553_v21 = vld [vmem:[%s2645_s6] ss:$0 sm:$0xff] }
 0x238   :  { %v865_v25 = vmax.f32 %v801_v23, 0.0  ;;  %v1894_v26 = vpop.f32.mrb[44].mxu1 }
 0x239   :  { %v1895_v28 = vpop.f32.mrb[45].mxu1 }
 0x23a   :  { %v1896_v42 = vadd.f32 %v1895_v28, %v1894_v26  ;;  %v1897_v29 = vpop.f32.mrb[46].mxu1  ;;  %v886_v30 = vpack.c.bf16 %v865_v25, %v864_v24 }
 0x23b   :  { %v1898_v43 = vpop.f32.mrb[47].mxu1 }
 0x23c   :  { %v806_v31 = vadd.f32 %v1896_v42, %v2516_v27  ;;  %v1899_v32 = vadd.f32 %v1898_v43, %v1897_v29  ;;  %2008 = vmatprep.mubr.bf16.mxu0 %v886_v30 }
 0x23e   :  { %v809_v33 = vadd.f32 %v1899_v32, %v2516_v27  ;;  %v866_v34 = vmax.f32 %v806_v31, 0.0 }
 0x240   :  { %v867_v35 = vmax.f32 %v809_v33, 0.0  ;;  %v1900_v36 = vpop.f32.mrb[48].mxu1 }
 0x241   :  { %v1901_v37 = vpop.f32.mrb[49].mxu1 }
 0x242   :  { %v1902_v38 = vadd.f32 %v1901_v37, %v1900_v36  ;;  %v1903_v39 = vpop.f32.mrb[50].mxu1  ;;  %v887_v40 = vpack.c.bf16 %v867_v35, %v866_v34 }
 0x243   :  { %v1904_v41 = vpop.f32.mrb[51].mxu1 }
 0x244   :  { %v814_v44 = vadd.f32 %v1902_v38, %v2516_v27  ;;  %v1905_v45 = vadd.f32 %v1904_v41, %v1903_v39  ;;  %2009 = vmatmul.mubr.bf16.gmra.mrb[84].mxu0 %v887_v40 }
 0x246   :  { %v817_v46 = vadd.f32 %v1905_v45, %v2516_v27  ;;  %v868_v47 = vmax.f32 %v814_v44, 0.0 }
 0x248   :  { %v869_v48 = vmax.f32 %v817_v46, 0.0  ;;  %v1906_v49 = vpop.f32.mrb[52].mxu1 }
 0x249   :  { %v1907_v51 = vpop.f32.mrb[53].mxu1 }
 0x24a   :  { %v1908_v52 = vadd.f32 %v1907_v51, %v1906_v49  ;;  %v1909_v53 = vpop.f32.mrb[54].mxu1  ;;  %v888_v54 = vpack.c.bf16 %v869_v48, %v868_v47 }
 0x24b   :  { %v1910_v55 = vpop.f32.mrb[55].mxu1 }
 0x24c   :  { %v822_v56 = vadd.f32 %v1908_v52, %v2516_v27  ;;  %v1911_v57 = vadd.f32 %v1910_v55, %v1909_v53  ;;  %2012 = vmatprep.mubr.bf16.mxu0 %v888_v54 }
 0x24e   :  { %v825_v59 = vadd.f32 %v1911_v57, %v2516_v27  ;;  %v870_v60 = vmax.f32 %v822_v56, 0.0 }
 0x250   :  { %v871_v61 = vmax.f32 %v825_v59, 0.0  ;;  %v1912_v62 = vpop.f32.mrb[56].mxu1 }
 0x251   :  { %v1913_v63 = vpop.f32.mrb[57].mxu1 }
 0x252   :  { %v1914_v0 = vadd.f32 %v1913_v63, %v1912_v62  ;;  %v1915_v1 = vpop.f32.mrb[58].mxu1  ;;  %v889_v2 = vpack.c.bf16 %v871_v61, %v870_v60 }
 0x253   :  { %v1916_v3 = vpop.f32.mrb[59].mxu1 }
 0x254   :  { %v830_v4 = vadd.f32 %v1914_v0, %v2516_v27  ;;  %v1917_v5 = vadd.f32 %v1916_v3, %v1915_v1  ;;  %2013 = vmatmul.mubr.bf16.gmra.mrb[88].mxu0 %v889_v2 }
 0x256   :  { %v833_v6 = vadd.f32 %v1917_v5, %v2516_v27  ;;  %v872_v7 = vmax.f32 %v830_v4, 0.0 }
 0x258   :  { %v873_v8 = vmax.f32 %v833_v6, 0.0  ;;  %v1918_v9 = vpop.f32.mrb[60].mxu1 }
 0x259   :  { %v1919_v10 = vpop.f32.mrb[61].mxu1 }
 0x25a   :  { %v1920_v11 = vadd.f32 %v1919_v10, %v1918_v9  ;;  %v1921_v12 = vpop.f32.mrb[62].mxu1  ;;  %v890_v13 = vpack.c.bf16 %v873_v8, %v872_v7 }
 0x25b   :  { %v1922_v14 = vpop.f32.mrb[63].mxu1 }
 0x25c   :  { %v838_v15 = vadd.f32 %v1920_v11, %v2516_v27  ;;  %v1923_v16 = vadd.f32 %v1922_v14, %v1921_v12  ;;  %2016 = vmatprep.mubr.bf16.mxu0 %v890_v13 }
 0x25e   :  { %v841_v17 = vadd.f32 %v1923_v16, %v2516_v27  ;;  %v874_v18 = vmax.f32 %v838_v15, 0.0 }
 0x260   :  { %v875_v19 = vmax.f32 %v841_v17, 0.0 }
 0x262   :  { %v891_v20 = vpack.c.bf16 %v875_v19, %v874_v18 }
 0x264   :  { %2017 = vmatmul.mubr.bf16.gmra.mrb[92].mxu0 %v891_v20 }
 0x2c7   :  { %v1990_v22 = vpop.f32.mrb[64].mxu0 }
 0x2c8   :  { %v1006_v23 = vadd.f32 %v1990_v22, %v2553_v21  ;;  %v997_v24 = vpop.f32.mrb[65].mxu0 }
 0x2c9   :  { %v998_v25 = vadd.f32 %v2553_v21, %v997_v24  ;;  %v1991_v26 = vpop.f32.mrb[66].mxu0 }
 0x2ca   :  { %v1009_v28 = vadd.f32 %v1991_v26, %v2553_v21  ;;  %v1000_v42 = vpop.f32.mrb[67].mxu0  ;;  %v1126_v29 = vmax.f32 %v1006_v23, 0.0 }
 0x2cb   :  { %v1001_v27 = vadd.f32 %v2553_v21, %v1000_v42  ;;  %v1124_v43 = vmax.f32 %v998_v25, 0.0 }
 0x2cc   :  { %v1127_v30 = vmax.f32 %v1009_v28, 0.0 }
 0x2cd   :  { %v1125_v31 = vmax.f32 %v1001_v27, 0.0 }
 0x2ce   :  { %v1157_v32 = vpack.c.bf16 %v1127_v30, %v1126_v29 }
 0x2cf   :  { %v1156_v33 = vpack.c.bf16 %v1125_v31, %v1124_v43 }
 0x2d1   :  { %2036 = vmatprep.mubr.bf16.mxu0 %v1156_v33 }
 0x2d2   :  { %2037 = vmatmul.mubr.bf16.vlgmr.msra.gmra.mrb[96].mxu0 %v1157_v32 }
 0x2d7   :  { %v1994_v34 = vpop.f32.mrb[68].mxu0 }
 0x2d8   :  { %v1022_v35 = vadd.f32 %v1994_v34, %v2553_v21  ;;  %v1013_v36 = vpop.f32.mrb[69].mxu0 }
 0x2d9   :  { %v1014_v37 = vadd.f32 %v2553_v21, %v1013_v36  ;;  %v1995_v38 = vpop.f32.mrb[70].mxu0 }
 0x2da   :  { %v1025_v39 = vadd.f32 %v1995_v38, %v2553_v21  ;;  %v1016_v40 = vpop.f32.mrb[71].mxu0  ;;  %v1130_v44 = vmax.f32 %v1022_v35, 0.0 }
 0x2db   :  { %v1017_v41 = vadd.f32 %v2553_v21, %v1016_v40  ;;  %v1128_v46 = vmax.f32 %v1014_v37, 0.0 }
 0x2dc   :  { %v1131_v45 = vmax.f32 %v1025_v39, 0.0 }
 0x2dd   :  { %v1129_v47 = vmax.f32 %v1017_v41, 0.0 }
 0x2de   :  { %v1159_v48 = vpack.c.bf16 %v1131_v45, %v1130_v44 }
 0x2df   :  { %v1158_v49 = vpack.c.bf16 %v1129_v47, %v1128_v46 }
 0x2e1   :  { %2040 = vmatprep.mubr.bf16.mxu1 %v1158_v49 }
 0x2e2   :  { %2041 = vmatmul.mubr.bf16.vlgmr.msra.gmra.mrb[64].mxu1 %v1159_v48 }
 0x2e7   :  { %v1998_v50 = vpop.f32.mrb[72].mxu0 }
 0x2e8   :  { %v1038_v51 = vadd.f32 %v1998_v50, %v2553_v21  ;;  %v1029_v52 = vpop.f32.mrb[73].mxu0 }
 0x2e9   :  { %v1030_v53 = vadd.f32 %v2553_v21, %v1029_v52  ;;  %v1999_v54 = vpop.f32.mrb[74].mxu0 }
 0x2ea   :  { %v1041_v55 = vadd.f32 %v1999_v54, %v2553_v21  ;;  %v1032_v56 = vpop.f32.mrb[75].mxu0  ;;  %v1134_v58 = vmax.f32 %v1038_v51, 0.0 }
 0x2eb   :  { %v1033_v57 = vadd.f32 %v2553_v21, %v1032_v56  ;;  %v1132_v60 = vmax.f32 %v1030_v53, 0.0 }
 0x2ec   :  { %v1135_v59 = vmax.f32 %v1041_v55, 0.0 }
 0x2ed   :  { %v1133_v61 = vmax.f32 %v1033_v57, 0.0 }
 0x2ee   :  { %v1161_v62 = vpack.c.bf16 %v1135_v59, %v1134_v58 }
 0x2ef   :  { %v1160_v63 = vpack.c.bf16 %v1133_v61, %v1132_v60 }
 0x2f1   :  { %2044 = vmatprep.mubr.bf16.mxu1 %v1160_v63 }
 0x2f2   :  { %2045 = vmatmul.mubr.bf16.gmra.mrb[68].mxu1 %v1161_v62 }
 0x2f7   :  { %v2002_v0 = vpop.f32.mrb[76].mxu0 }
 0x2f8   :  { %v1054_v1 = vadd.f32 %v2002_v0, %v2553_v21  ;;  %v1045_v2 = vpop.f32.mrb[77].mxu0 }
 0x2f9   :  { %v1046_v3 = vadd.f32 %v2553_v21, %v1045_v2  ;;  %v2003_v4 = vpop.f32.mrb[78].mxu0 }
 0x2fa   :  { %v1057_v5 = vadd.f32 %v2003_v4, %v2553_v21  ;;  %v1048_v6 = vpop.f32.mrb[79].mxu0  ;;  %v1138_v8 = vmax.f32 %v1054_v1, 0.0 }
 0x2fb   :  { %v1049_v7 = vadd.f32 %v2553_v21, %v1048_v6  ;;  %v1136_v10 = vmax.f32 %v1046_v3, 0.0 }
 0x2fc   :  { %v1139_v9 = vmax.f32 %v1057_v5, 0.0 }
 0x2fd   :  { %v1137_v11 = vmax.f32 %v1049_v7, 0.0 }
 0x2fe   :  { %v1163_v12 = vpack.c.bf16 %v1139_v9, %v1138_v8  ;;  %v2590_v8 = vld [vmem:[%s2647_s8] ss:$0 sm:$0xff]  ;;  %s2221_s8 = smov [#allocation7]  }
 0x2ff   :  { %v1162_v13 = vpack.c.bf16 %v1137_v11, %v1136_v10  ;;  %s1569_s23 = sshll.u32 %s2221_s8, 4  ;;  %s1570_s23 = int_to_ptr.vmem [resolvable:$true] %s1569_s23 }
 0x300   :  { %s2188_s24 = scalar_lea.vmem %s1570_s23, 2048  ;;  %p2193_p3 = scmp.lt.s32.totalorder %s1570_s23, %s1570_s23 }
 0x301   :  { %2048 = vmatprep.mubr.bf16.mxu1 %v1162_v13  ;;  %p2189_p2 = scmp.ne.s32.totalorder %s1570_s23, %s2188_s24  ;;  %p2194_p4 = scmp.lt.s32.totalorder %s2188_s24, %s2188_s24 }
 0x302   :  { %2049 = vmatmul.mubr.bf16.gmra.mrb[72].mxu1 %v1163_v12 }
 0x303   :  { %p2195_p5 = por %p2194_p4, %p2193_p3 }
 0x305   :  { %p2196_p6 = pnand %p2195_p5, %p2189_p2 }
 0x307   :  { %v2006_v14 = vpop.f32.mrb[80].mxu0 }
 0x308   :  { %v1070_v15 = vadd.f32 %v2006_v14, %v2553_v21  ;;  %v1061_v16 = vpop.f32.mrb[81].mxu0 }
 0x309   :  { %v1062_v17 = vadd.f32 %v2553_v21, %v1061_v16  ;;  %v2007_v18 = vpop.f32.mrb[82].mxu0 }
 0x30a   :  { %v1073_v19 = vadd.f32 %v2007_v18, %v2553_v21  ;;  %v1064_v20 = vpop.f32.mrb[83].mxu0  ;;  %v1142_v23 = vmax.f32 %v1070_v15, 0.0 }
 0x30b   :  { %v1065_v22 = vadd.f32 %v2553_v21, %v1064_v20  ;;  %v1140_v25 = vmax.f32 %v1062_v17, 0.0 }
 0x30c   :  { %v1143_v24 = vmax.f32 %v1073_v19, 0.0 }
 0x30d   :  { %v1141_v26 = vmax.f32 %v1065_v22, 0.0 }
 0x30e   :  { %v1165_v28 = vpack.c.bf16 %v1143_v24, %v1142_v23 }
 0x30f   :  { %v1164_v42 = vpack.c.bf16 %v1141_v26, %v1140_v25 }
 0x311   :  { %2052 = vmatprep.mubr.bf16.mxu1 %v1164_v42 }
 0x312   :  { %2053 = vmatmul.mubr.bf16.gmra.mrb[76].mxu1 %v1165_v28 }
 0x317   :  { %v2010_v27 = vpop.f32.mrb[84].mxu0 }
 0x318   :  { %v1086_v29 = vadd.f32 %v2010_v27, %v2553_v21  ;;  %v1077_v30 = vpop.f32.mrb[85].mxu0 }
 0x319   :  { %v1078_v43 = vadd.f32 %v2553_v21, %v1077_v30  ;;  %v2011_v31 = vpop.f32.mrb[86].mxu0 }
 0x31a   :  { %v1089_v32 = vadd.f32 %v2011_v31, %v2553_v21  ;;  %v1080_v33 = vpop.f32.mrb[87].mxu0  ;;  %v1146_v35 = vmax.f32 %v1086_v29, 0.0 }
 0x31b   :  { %v1081_v34 = vadd.f32 %v2553_v21, %v1080_v33  ;;  %v1144_v37 = vmax.f32 %v1078_v43, 0.0 }
 0x31c   :  { %v1147_v36 = vmax.f32 %v1089_v32, 0.0 }
 0x31d   :  { %v1145_v38 = vmax.f32 %v1081_v34, 0.0 }
 0x31e   :  { %v1167_v39 = vpack.c.bf16 %v1147_v36, %v1146_v35 }
 0x31f   :  { %v1166_v40 = vpack.c.bf16 %v1145_v38, %v1144_v37 }
 0x321   :  { %2056 = vmatprep.mubr.bf16.mxu1 %v1166_v40 }
 0x322   :  { %2057 = vmatmul.mubr.bf16.gmra.mrb[80].mxu1 %v1167_v39 }
 0x327   :  { %v2014_v41 = vpop.f32.mrb[88].mxu0 }
 0x328   :  { %v1102_v44 = vadd.f32 %v2014_v41, %v2553_v21  ;;  %v1093_v45 = vpop.f32.mrb[89].mxu0 }
 0x329   :  { %v1094_v46 = vadd.f32 %v2553_v21, %v1093_v45  ;;  %v2015_v47 = vpop.f32.mrb[90].mxu0 }
 0x32a   :  { %v1105_v48 = vadd.f32 %v2015_v47, %v2553_v21  ;;  %v1096_v49 = vpop.f32.mrb[91].mxu0  ;;  %v1150_v51 = vmax.f32 %v1102_v44, 0.0 }
 0x32b   :  { %v1097_v50 = vadd.f32 %v2553_v21, %v1096_v49  ;;  %v1148_v53 = vmax.f32 %v1094_v46, 0.0 }
 0x32c   :  { %v1151_v52 = vmax.f32 %v1105_v48, 0.0 }
 0x32d   :  { %v1149_v54 = vmax.f32 %v1097_v50, 0.0 }
 0x32e   :  { %v1169_v55 = vpack.c.bf16 %v1151_v52, %v1150_v51 }
 0x32f   :  { %v1168_v56 = vpack.c.bf16 %v1149_v54, %v1148_v53 }
 0x331   :  { %2060 = vmatprep.mubr.bf16.mxu1 %v1168_v56 }
 0x332   :  { %2061 = vmatmul.mubr.bf16.gmra.mrb[84].mxu1 %v1169_v55 }
 0x337   :  { %v2018_v57 = vpop.f32.mrb[92].mxu0 }
 0x338   :  { %v1118_v58 = vadd.f32 %v2018_v57, %v2553_v21  ;;  %v1109_v59 = vpop.f32.mrb[93].mxu0 }
 0x339   :  { %v1110_v60 = vadd.f32 %v2553_v21, %v1109_v59  ;;  %v2019_v61 = vpop.f32.mrb[94].mxu0 }
 0x33a   :  { %v1121_v62 = vadd.f32 %v2019_v61, %v2553_v21  ;;  %v1112_v63 = vpop.f32.mrb[95].mxu0  ;;  %v1154_v1 = vmax.f32 %v1118_v58, 0.0 }
 0x33b   :  { %v1113_v0 = vadd.f32 %v2553_v21, %v1112_v63  ;;  %v1152_v3 = vmax.f32 %v1110_v60, 0.0 }
 0x33c   :  { %v1155_v2 = vmax.f32 %v1121_v62, 0.0 }
 0x33d   :  { %v1153_v4 = vmax.f32 %v1113_v0, 0.0 }
 0x33e   :  { %v1171_v5 = vpack.c.bf16 %v1155_v2, %v1154_v1 }
 0x33f   :  { %v1170_v6 = vpack.c.bf16 %v1153_v4, %v1152_v3 }
 0x341   :  { %2064 = vmatprep.mubr.bf16.mxu1 %v1170_v6 }
 0x342   :  { %2065 = vmatmul.mubr.bf16.gmra.mrb[88].mxu1 %v1171_v5 }
 0x3a5   :  { %v2038_v7 = vpop.f32.mrb[96].mxu0 }
 0x3a6   :  { %v1277_v9 = vpop.f32.mrb[97].mxu0  ;;  %v1286_v11 = vadd.f32 %v2038_v7, %v2590_v8 }
 0x3a7   :  { %v2039_v10 = vpop.f32.mrb[98].mxu0  ;;  %v1278_v13 = vadd.f32 %v2590_v8, %v1277_v9 }
 0x3a8   :  { %v1289_v21 = vadd.f32 %v2039_v10, %v2590_v8  ;;  %v1280_v12 = vpop.f32.mrb[99].mxu0 }
 0x3a9   :  { %v1281_v14 = vadd.f32 %v2590_v8, %v1280_v12 }
 0x3aa   :  { %v1725_v15 = vpack.c.bf16 %v1289_v21, %v1286_v11 }
 0x3ab   :  { %v1720_v16 = vpack.c.bf16 %v1281_v14, %v1278_v13 }
 0x3ac   :  { %1797 = vst [vmem:[#allocation7 + $0x8] sm:$0xff] %v1725_v15  }
 0x3ad   :  { %1721 = vst [vmem:[#allocation7] sm:$0xff] %v1720_v16  }
 0x3b5   :  { %v2042_v17 = vpop.f32.mrb[64].mxu1 }
 0x3b6   :  { %v1293_v18 = vpop.f32.mrb[65].mxu1  ;;  %v1302_v20 = vadd.f32 %v2042_v17, %v2590_v8 }
 0x3b7   :  { %v2043_v19 = vpop.f32.mrb[66].mxu1  ;;  %v1294_v24 = vadd.f32 %v2590_v8, %v1293_v18 }
 0x3b8   :  { %v1305_v22 = vadd.f32 %v2043_v19, %v2590_v8  ;;  %v1296_v23 = vpop.f32.mrb[67].mxu1 }
 0x3b9   :  { %v1297_v25 = vadd.f32 %v2590_v8, %v1296_v23 }
 0x3ba   :  { %v1735_v26 = vpack.c.bf16 %v1305_v22, %v1302_v20 }
 0x3bb   :  { %v1730_v28 = vpack.c.bf16 %v1297_v25, %v1294_v24 }
 0x3bc   :  { %1799 = vst [vmem:[#allocation7 + $0x18] sm:$0xff] %v1735_v26  }
 0x3bd   :  { %1798 = vst [vmem:[#allocation7 + $0x10] sm:$0xff] %v1730_v28  }
 0x3c5   :  { %v2046_v42 = vpop.f32.mrb[68].mxu1 }
 0x3c6   :  { %v1309_v27 = vpop.f32.mrb[69].mxu1  ;;  %v1318_v30 = vadd.f32 %v2046_v42, %v2590_v8 }
 0x3c7   :  { %v2047_v29 = vpop.f32.mrb[70].mxu1  ;;  %v1310_v32 = vadd.f32 %v2590_v8, %v1309_v27 }
 0x3c8   :  { %v1321_v43 = vadd.f32 %v2047_v29, %v2590_v8  ;;  %v1312_v31 = vpop.f32.mrb[71].mxu1 }
 0x3c9   :  { %v1313_v33 = vadd.f32 %v2590_v8, %v1312_v31 }
 0x3ca   :  { %v1745_v34 = vpack.c.bf16 %v1321_v43, %v1318_v30 }
 0x3cb   :  { %v1740_v35 = vpack.c.bf16 %v1313_v33, %v1310_v32 }
 0x3cc   :  { %1801 = vst [vmem:[#allocation7 + $0x28] sm:$0xff] %v1745_v34  }
 0x3cd   :  { %1800 = vst [vmem:[#allocation7 + $0x20] sm:$0xff] %v1740_v35  }
 0x3d5   :  { %v2050_v36 = vpop.f32.mrb[72].mxu1 }
 0x3d6   :  { %v1325_v37 = vpop.f32.mrb[73].mxu1  ;;  %v1334_v39 = vadd.f32 %v2050_v36, %v2590_v8 }
 0x3d7   :  { %v2051_v38 = vpop.f32.mrb[74].mxu1  ;;  %v1326_v44 = vadd.f32 %v2590_v8, %v1325_v37 }
 0x3d8   :  { %v1337_v40 = vadd.f32 %v2051_v38, %v2590_v8  ;;  %v1328_v41 = vpop.f32.mrb[75].mxu1 }
 0x3d9   :  { %v1329_v45 = vadd.f32 %v2590_v8, %v1328_v41 }
 0x3da   :  { %v1755_v46 = vpack.c.bf16 %v1337_v40, %v1334_v39 }
 0x3db   :  { %v1750_v47 = vpack.c.bf16 %v1329_v45, %v1326_v44 }
 0x3dc   :  { %1803 = vst [vmem:[#allocation7 + $0x38] sm:$0xff] %v1755_v46  }
 0x3dd   :  { %1802 = vst [vmem:[#allocation7 + $0x30] sm:$0xff] %v1750_v47  }
 0x3e5   :  { %v2054_v48 = vpop.f32.mrb[76].mxu1 }
 0x3e6   :  { %v1341_v49 = vpop.f32.mrb[77].mxu1  ;;  %v1350_v51 = vadd.f32 %v2054_v48, %v2590_v8 }
 0x3e7   :  { %v2055_v50 = vpop.f32.mrb[78].mxu1  ;;  %v1342_v54 = vadd.f32 %v2590_v8, %v1341_v49 }
 0x3e8   :  { %v1353_v52 = vadd.f32 %v2055_v50, %v2590_v8  ;;  %v1344_v53 = vpop.f32.mrb[79].mxu1 }
 0x3e9   :  { %v1345_v55 = vadd.f32 %v2590_v8, %v1344_v53 }
 0x3ea   :  { %v1765_v56 = vpack.c.bf16 %v1353_v52, %v1350_v51 }
 0x3eb   :  { %v1760_v57 = vpack.c.bf16 %v1345_v55, %v1342_v54 }
 0x3ec   :  { %1805 = vst [vmem:[#allocation7 + $0x48] sm:$0xff] %v1765_v56  }
 0x3ed   :  { %1804 = vst [vmem:[#allocation7 + $0x40] sm:$0xff] %v1760_v57  }
 0x3f5   :  { %v2058_v58 = vpop.f32.mrb[80].mxu1 }
 0x3f6   :  { %v1357_v59 = vpop.f32.mrb[81].mxu1  ;;  %v1366_v61 = vadd.f32 %v2058_v58, %v2590_v8 }
 0x3f7   :  { %v2059_v60 = vpop.f32.mrb[82].mxu1  ;;  %v1358_v0 = vadd.f32 %v2590_v8, %v1357_v59 }
 0x3f8   :  { %v1369_v62 = vadd.f32 %v2059_v60, %v2590_v8  ;;  %v1360_v63 = vpop.f32.mrb[83].mxu1 }
 0x3f9   :  { %v1361_v1 = vadd.f32 %v2590_v8, %v1360_v63 }
 0x3fa   :  { %v1775_v2 = vpack.c.bf16 %v1369_v62, %v1366_v61 }
 0x3fb   :  { %v1770_v3 = vpack.c.bf16 %v1361_v1, %v1358_v0 }
 0x3fc   :  { %1807 = vst [vmem:[#allocation7 + $0x58] sm:$0xff] %v1775_v2  }
 0x3fd   :  { %1806 = vst [vmem:[#allocation7 + $0x50] sm:$0xff] %v1770_v3  }
 0x405   :  { %v2062_v4 = vpop.f32.mrb[84].mxu1 }
 0x406   :  { %v1373_v5 = vpop.f32.mrb[85].mxu1  ;;  %v1382_v7 = vadd.f32 %v2062_v4, %v2590_v8 }
 0x407   :  { %v2063_v6 = vpop.f32.mrb[86].mxu1  ;;  %v1374_v11 = vadd.f32 %v2590_v8, %v1373_v5 }
 0x408   :  { %v1385_v9 = vadd.f32 %v2063_v6, %v2590_v8  ;;  %v1376_v10 = vpop.f32.mrb[87].mxu1 }
 0x409   :  { %v1377_v21 = vadd.f32 %v2590_v8, %v1376_v10 }
 0x40a   :  { %v1785_v12 = vpack.c.bf16 %v1385_v9, %v1382_v7 }
 0x40b   :  { %v1780_v13 = vpack.c.bf16 %v1377_v21, %v1374_v11 }
 0x40c   :  { %1809 = vst [vmem:[#allocation7 + $0x68] sm:$0xff] %v1785_v12  }
 0x40d   :  { %1808 = vst [vmem:[#allocation7 + $0x60] sm:$0xff] %v1780_v13  }
 0x415   :  { %v2066_v14 = vpop.f32.mrb[88].mxu1 }
 0x416   :  { %v1389_v15 = vpop.f32.mrb[89].mxu1  ;;  %v1398_v17 = vadd.f32 %v2066_v14, %v2590_v8 }
 0x417   :  { %v2067_v16 = vpop.f32.mrb[90].mxu1  ;;  %v1390_v20 = vadd.f32 %v2590_v8, %v1389_v15 }
 0x418   :  { %v1401_v18 = vadd.f32 %v2067_v16, %v2590_v8  ;;  %v1392_v19 = vpop.f32.mrb[91].mxu1 }
 0x419   :  { %v1393_v22 = vadd.f32 %v2590_v8, %v1392_v19 }
 0x41a   :  { %v1795_v23 = vpack.c.bf16 %v1401_v18, %v1398_v17 }
 0x41b   :  { %v1790_v24 = vpack.c.bf16 %v1393_v22, %v1390_v20 }
 0x41c   :  { %1811 = vst [vmem:[#allocation7 + $0x78] sm:$0xff] %v1795_v23  }
 0x41d   :  { %1810 = vst [vmem:[#allocation7 + $0x70] sm:$0xff] %v1790_v24  }
 0x41e   :  { %2199 = shalt.err (!%p2196_p6)
}
 0x41f   :  { %s2200_s26 = scalar_lea.hbm %s2648_s9, 2048 }
 0x420   :  { %p2201_p7 = scmp.ne.s32.totalorder %s2648_s9, %s2200_s26  ;;  %p2204_p8 = scmp.lt.u32.totalorder %s2200_s26, %s2648_s9 }
 0x422   :  { %p2206_p9 = pnand %p2204_p8, %p2201_p7 }
 0x424   :  { %2209 = shalt.err (!%p2206_p9)
}
 0x425   :  { %1575 = dma.vmem_to_hbm [thread:$0]  %s1570_s23, 2048, %s2648_s9, [#allocation4], %s2217_s19, %s2217_s19, %s2218_s20  }
 0x426   :  { %2214 = dma.done.wait [#allocation4], 2048  }
 0x427   :  { %2215 = vsyncadd [#allocation4], 4294965248 }
 0x428   :  { %1579 = vsyncpa [#allocation3], 1 }
 0x429   :  { %1580 = vsyncpa [#allocation6], 1 }
 0x42a   :  { %1581 = vsyncpa [#allocation4], 1 }

</bundles_post_ra>
